<compile_context>
chip_gen: v7x
topology: tpu7x:2x2x1
jax: 0.10.0
libtpu: 0.0.40
codegen_flags: <defaults>
</compile_context>

<pallas_src>
import functools

import jax
import jax.numpy as jnp
from jax.experimental import pallas as pl
from jax.experimental.pallas import tpu as pltpu


_VMEM_SPEC = pl.BlockSpec(memory_space=pltpu.MemorySpace.VMEM)


def _round8(n):
    return ((n + 7) // 8) * 8


# ----------------------------------------------------------------------------
# One-time parameter packing (plain JAX, runs at init — not in the hot path)
# ----------------------------------------------------------------------------
def _conv_row_toeplitz(w, in_width, out_width, k_pad=128, n_pad=256):
    """Per-kernel-row Toeplitz matrices baking im2col into the conv weights.

    Input rows (K):   k(c, wpos) = c * in_width + wpos            (< k_pad)
    Output cols (N):  col(oc, ow) = (ow % 2)*128 + oc*(OW//2) + ow//2
    so the 2x2 W-pool is max(cols[:128], cols[128:256]).
    Returns T of shape [KH, k_pad, n_pad] (float32; caller casts to bf16).
    """
    w = jnp.asarray(w, jnp.float32)
    OC, IC, KH, KW = w.shape
    half = out_width // 2
    oc = jnp.arange(OC)[:, None, None]
    ci = jnp.arange(IC)[None, :, None]
    ow = jnp.arange(out_width)[None, None, :]
    col = jnp.broadcast_to((ow % 2) * 128 + oc * half + ow // 2,
                           (OC, IC, out_width)).reshape(-1)
    mats = []
    for i in range(KH):
        ti = jnp.zeros((k_pad, n_pad), jnp.float32)
        for j in range(KW):
            row = jnp.broadcast_to(ci * in_width + ow + j,
                                   (OC, IC, out_width)).reshape(-1)
            val = jnp.broadcast_to(w[:, :, i, j][:, :, None],
                                   (OC, IC, out_width)).reshape(-1)
            ti = ti.at[row, col].set(val)
        mats.append(ti)
    return jnp.stack(mats, axis=0)


def _conv_bias_row(b, out_width, n_pad=256):
    """Bias laid out to match the conv output column layout above; [1, n_pad]."""
    b = jnp.asarray(b, jnp.float32)
    OC = b.shape[0]
    half = out_width // 2
    oc = jnp.arange(OC)[:, None]
    ow = jnp.arange(out_width)[None, :]
    col = ((ow % 2) * 128 + oc * half + ow // 2).reshape(-1)
    val = jnp.broadcast_to(b[:, None], (OC, out_width)).reshape(-1)
    return jnp.zeros((n_pad,), jnp.float32).at[col].set(val).reshape(1, n_pad)


def _fc1_folded(w3, n_pad=128):
    """Fold the PyTorch flatten of [B,16,5,5] into fc1.

    w3: [400, 120] (feature-major, flatten order f = oc*25 + ph*5 + pw).
    Returns [5, 128, 128] with W[ph][oc*5 + pw, n] = w3[oc*25 + ph*5 + pw, n],
    matching the pooled-conv2 lane layout col = oc*5 + pw.
    """
    w3 = jnp.asarray(w3, jnp.float32)
    oc = jnp.arange(16)[:, None]
    pw = jnp.arange(5)[None, :]
    col_in = (oc * 5 + pw).reshape(-1)                       # [80]
    mats = []
    for ph in range(5):
        f = (oc * 25 + ph * 5 + pw).reshape(-1)              # [80]
        rows = jnp.pad(w3[f, :], ((0, 0), (0, n_pad - 120)))  # [80, 128]
        mats.append(jnp.zeros((n_pad, n_pad), jnp.float32).at[col_in].set(rows))
    return jnp.stack(mats, axis=0)


def _pool_select(n_out_h, batch):
    """Merged even/odd one-hot H-pool selection matrix, bf16.

    Conv output rows are laid out h-major (row = oh*batch + b).  Returns a
    [2*off, 2*n_out_h*batch] matrix where rows [0, n_out_h*batch) select the
    even input rows (oh = 2*ph) and rows [off, off + n_out_h*batch) select the
    odd input rows (oh = 2*ph+1), both emitted in ph-major (ph*batch + b)
    order; off = round_up(n_out_h*batch, 8) so the kernel can take
    max(r[:off], r[off:]) with aligned sublane slices.
    """
    rows_in = 2 * n_out_h * batch
    off = _round8(n_out_h * batch)
    ph = jnp.arange(n_out_h)[:, None]
    b = jnp.arange(batch)[None, :]
    out_r = (ph * batch + b).reshape(-1)
    even_in = (2 * ph * batch + b).reshape(-1)
    odd_in = ((2 * ph + 1) * batch + b).reshape(-1)
    sel = jnp.zeros((2 * off, rows_in), jnp.float32)
    sel = sel.at[out_r, even_in].set(1.0)
    sel = sel.at[off + out_r, odd_in].set(1.0)
    return sel.astype(jnp.bfloat16)


def prepare_params(raw, batch):
    """Turn raw PyTorch-layout parameters into kernel-ready packed matrices."""
    bf16 = jnp.bfloat16
    p = {}
    p["t1"] = _conv_row_toeplitz(raw["w1"], 32, 28).astype(bf16)   # [5,128,256]
    p["b1row"] = _conv_bias_row(raw["b1"], 28)                     # [1,256] f32
    p["t2"] = _conv_row_toeplitz(raw["w2"], 14, 10).astype(bf16)   # [5,128,256]
    p["b2row"] = _conv_bias_row(raw["b2"], 10)                     # [1,256] f32
    p["p1sel"] = _pool_select(14, batch)                           # [64, 28*B]
    p["p2sel"] = _pool_select(5, batch)                            # [32, 10*B]
    p["w3h"] = _fc1_folded(raw["w3"]).astype(bf16)                 # [5,128,128]
    p["b3row"] = jnp.pad(jnp.asarray(raw["b3"], jnp.float32), (0, 8)).reshape(1, 128)
    p["w4p"] = jnp.pad(jnp.asarray(raw["w4"], jnp.float32),
                       ((0, 8), (0, 44))).astype(bf16)
    p["b4row"] = jnp.pad(jnp.asarray(raw["b4"], jnp.float32), (0, 44)).reshape(1, 128)
    p["w5p"] = jnp.pad(jnp.asarray(raw["w5"], jnp.float32),
                       ((0, 44), (0, 118))).astype(bf16)
    p["b5row"] = jnp.pad(jnp.asarray(raw["b5"], jnp.float32), (0, 118)).reshape(1, 128)
    return p


# ----------------------------------------------------------------------------
# Fused LeNet kernel (single pallas_call, no grid, batch stacked into M)
# ----------------------------------------------------------------------------
def _lenet_fused_kernel(x_ref, t1_ref, b1_ref, t2_ref, b2_ref,
                        p1sel_ref, p2sel_ref,
                        w3_ref, b3_ref, w4_ref, b4_ref, w5_ref, b5_ref,
                        out_ref, *, batch):
    f32, bf16 = jnp.float32, jnp.bfloat16
    B = batch
    off1 = _round8(14 * B)   # pool1 odd-block sublane offset
    off2 = _round8(5 * B)    # pool2 odd-block sublane offset

    def mm(a, b):
        return jnp.dot(a, b, preferred_element_type=f32)

    # ---- conv1 (3->6, 5x5) + bias + ReLU : [28*B, 256], rows = oh*B + b ----
    # h-major input rows make each kernel-row LHS a single contiguous slice.
    acc1 = mm(x_ref[pl.ds(0, 28 * B), :].astype(bf16), t1_ref[0])
    for i in range(1, 5):
        acc1 = acc1 + mm(x_ref[pl.ds(i * B, 28 * B), :].astype(bf16), t1_ref[i])
    s1 = jnp.maximum(acc1 + b1_ref[...], 0.0).astype(bf16)

    # ---- maxpool1 2x2: H via one merged selection matmul, W via lane halves ----
    r1 = mm(p1sel_ref[...], s1)                         # [2*off1, 256]
    rh1 = jnp.maximum(r1[:off1], r1[off1:])             # [off1, 256]
    p1 = jnp.maximum(rh1[:, 0:128], rh1[:, 128:256])    # [off1, 128], rows ph*B+b

    # ---- conv2 (6->16, 5x5) + bias + ReLU : [10*B, 256], rows = oh*B + b ----
    acc2 = mm(p1[0:10 * B].astype(bf16), t2_ref[0])
    for i in range(1, 5):
        acc2 = acc2 + mm(p1[i * B:(i + 10) * B].astype(bf16), t2_ref[i])
    s2 = jnp.maximum(acc2 + b2_ref[...], 0.0).astype(bf16)

    # ---- maxpool2 2x2 ----
    r2 = mm(p2sel_ref[...], s2)                         # [2*off2, 256]
    rh2 = jnp.maximum(r2[:off2], r2[off2:])             # [off2, 256]
    p2 = jnp.maximum(rh2[:, 0:128], rh2[:, 128:256])    # [off2, 128], rows ph*B+b

    # ---- fc1 (flatten folded into weights) + ReLU : [B, 128] ----
    y = mm(p2[0:B].astype(bf16), w3_ref[0])
    for ph in range(1, 5):
        y = y + mm(p2[ph * B:(ph + 1) * B].astype(bf16), w3_ref[ph])
    y = jnp.maximum(y + b3_ref[...], 0.0).astype(bf16)

    # ---- fc2 + ReLU ----
    y = jnp.maximum(mm(y, w4_ref[...]) + b4_ref[...], 0.0).astype(bf16)

    # ---- fc3 : single lane-dense [B, 128] store ----
    out_ref[...] = mm(y, w5_ref[...]) + b5_ref[...]


def lenet_forward(params, x):
    """LeNet forward. x: [B, 3, 32, 32] NCHW (PyTorch layout). Returns [B, 10]."""
    B, C, H, W = x.shape
    assert (C, H, W) == (3, 32, 32)
    assert params["p1sel"].shape[1] == 28 * B, "params packed for a different batch"
    # Boundary layout transform only: NCHW -> [H*B, 128], rows h-major
    # (row = h*B + b), cols = c*W + w, lane-padded to 128.  Tiny one-off op.
    x2d = x.astype(jnp.float32).transpose(2, 0, 1, 3).reshape(H * B, C * W)
    x2d = jnp.pad(x2d, ((0, 0), (0, 128 - C * W)))
    out = pl.pallas_call(
        functools.partial(_lenet_fused_kernel, batch=B),
        out_shape=jax.ShapeDtypeStruct((B, 128), jnp.float32),
        in_specs=[_VMEM_SPEC] * 13,
        out_specs=_VMEM_SPEC,
    )(x2d, params["t1"], params["b1row"], params["t2"], params["b2row"],
      params["p1sel"], params["p2sel"],
      params["w3h"], params["b3row"], params["w4p"], params["b4row"],
      params["w5p"], params["b5row"])
    return out[:, :10]


# ----------------------------------------------------------------------------
# Deterministic raw-parameter init (PyTorch-default-style uniform)
# ----------------------------------------------------------------------------
def _uniform(key, shape, fan_in):
    bound = 1.0 / jnp.sqrt(jnp.float32(fan_in))
    return jax.random.uniform(key, shape, jnp.float32, -bound, bound)


def init_lenet_raw_params(key):
    ks = jax.random.split(key, 10)
    p = {}
    p["w1"] = _uniform(ks[0], (6, 3, 5, 5), 3 * 5 * 5)
    p["b1"] = _uniform(ks[1], (6,), 3 * 5 * 5)
    p["w2"] = _uniform(ks[2], (16, 6, 5, 5), 6 * 5 * 5)
    p["b2"] = _uniform(ks[3], (16,), 6 * 5 * 5)
    p["w3"] = _uniform(ks[4], (400, 120), 400)   # fc1 stored as [in, out]
    p["b3"] = _uniform(ks[5], (120,), 400)
    p["w4"] = _uniform(ks[6], (120, 84), 120)    # fc2 [in, out]
    p["b4"] = _uniform(ks[7], (84,), 120)
    p["w5"] = _uniform(ks[8], (84, 10), 84)      # fc3 [in, out]
    p["b5"] = _uniform(ks[9], (10,), 84)
    return p


if __name__ == "__main__":
    key = jax.random.PRNGKey(0)
    pkey, xkey = jax.random.split(key)
    B = 2
    params = prepare_params(init_lenet_raw_params(pkey), batch=B)
    # LeNet's fc1 (16*5*5) implies a 32x32 spatial input; keep batch small.
    x = jax.random.normal(xkey, (B, 3, 32, 32), jnp.float32)

    logits = jax.jit(lenet_forward)(params, x)
    jax.block_until_ready(logits)
    assert logits.shape == (B, 10), logits.shape
    print("KERNEL_OK")
</pallas_src>

<mosaic_0001>
module attributes {stable_mosaic.version = 11 : i64} {
  func.func @_lenet_fused_kernel(%arg0: memref<64x128xf32, #tpu.memory_space<vmem>>, %arg1: memref<5x128x256xbf16, #tpu.memory_space<vmem>>, %arg2: memref<1x256xf32, #tpu.memory_space<vmem>>, %arg3: memref<5x128x256xbf16, #tpu.memory_space<vmem>>, %arg4: memref<1x256xf32, #tpu.memory_space<vmem>>, %arg5: memref<64x56xbf16, #tpu.memory_space<vmem>>, %arg6: memref<32x20xbf16, #tpu.memory_space<vmem>>, %arg7: memref<5x128x128xbf16, #tpu.memory_space<vmem>>, %arg8: memref<1x128xf32, #tpu.memory_space<vmem>>, %arg9: memref<128x128xbf16, #tpu.memory_space<vmem>>, %arg10: memref<1x128xf32, #tpu.memory_space<vmem>>, %arg11: memref<128x128xbf16, #tpu.memory_space<vmem>>, %arg12: memref<1x128xf32, #tpu.memory_space<vmem>>, %arg13: memref<2x128xf32, #tpu.memory_space<vmem>>) attributes {dimension_semantics = [], scalar_prefetch = 0 : i64, scratch_operands = 0 : i64, tpu.core_type = #tpu.core_type<tc>} {
    %c0 = arith.constant 0 : index
    %c0_0 = arith.constant 0 : index
    %0 = vector.load %arg0[%c0, %c0_0] : memref<64x128xf32, #tpu.memory_space<vmem>>, vector<56x128xf32>
    %1 = arith.truncf %0 : vector<56x128xf32> to vector<56x128xbf16>
    %c0_1 = arith.constant 0 : index
    %c0_2 = arith.constant 0 : index
    %c0_3 = arith.constant 0 : index
    %2 = vector.load %arg1[%c0_1, %c0_2, %c0_3] : memref<5x128x256xbf16, #tpu.memory_space<vmem>>, vector<1x128x256xbf16>
    %3 = vector.shape_cast %2 : vector<1x128x256xbf16> to vector<128x256xbf16>
    %cst = arith.constant dense<0.000000e+00> : vector<56x256xf32>
    %4 = tpu.matmul %1, %3, %cst {dimension_numbers = #tpu.dot_dimension_numbers<[1], [0], [0], [1], [0, 0, 1, 1], [], []>} : vector<56x128xbf16>, vector<128x256xbf16>, vector<56x256xf32> -> vector<56x256xf32>
    %c2 = arith.constant 2 : index
    %c0_4 = arith.constant 0 : index
    %5 = vector.load %arg0[%c2, %c0_4] : memref<64x128xf32, #tpu.memory_space<vmem>>, vector<56x128xf32>
    %6 = arith.truncf %5 : vector<56x128xf32> to vector<56x128xbf16>
    %c1 = arith.constant 1 : index
    %c0_5 = arith.constant 0 : index
    %c0_6 = arith.constant 0 : index
    %7 = vector.load %arg1[%c1, %c0_5, %c0_6] : memref<5x128x256xbf16, #tpu.memory_space<vmem>>, vector<1x128x256xbf16>
    %8 = vector.shape_cast %7 : vector<1x128x256xbf16> to vector<128x256xbf16>
    %cst_7 = arith.constant dense<0.000000e+00> : vector<56x256xf32>
    %9 = tpu.matmul %6, %8, %cst_7 {dimension_numbers = #tpu.dot_dimension_numbers<[1], [0], [0], [1], [0, 0, 1, 1], [], []>} : vector<56x128xbf16>, vector<128x256xbf16>, vector<56x256xf32> -> vector<56x256xf32>
    %10 = arith.addf %4, %9 : vector<56x256xf32>
    %c4 = arith.constant 4 : index
    %c0_8 = arith.constant 0 : index
    %11 = vector.load %arg0[%c4, %c0_8] : memref<64x128xf32, #tpu.memory_space<vmem>>, vector<56x128xf32>
    %12 = arith.truncf %11 : vector<56x128xf32> to vector<56x128xbf16>
    %c2_9 = arith.constant 2 : index
    %c0_10 = arith.constant 0 : index
    %c0_11 = arith.constant 0 : index
    %13 = vector.load %arg1[%c2_9, %c0_10, %c0_11] : memref<5x128x256xbf16, #tpu.memory_space<vmem>>, vector<1x128x256xbf16>
    %14 = vector.shape_cast %13 : vector<1x128x256xbf16> to vector<128x256xbf16>
    %cst_12 = arith.constant dense<0.000000e+00> : vector<56x256xf32>
    %15 = tpu.matmul %12, %14, %cst_12 {dimension_numbers = #tpu.dot_dimension_numbers<[1], [0], [0], [1], [0, 0, 1, 1], [], []>} : vector<56x128xbf16>, vector<128x256xbf16>, vector<56x256xf32> -> vector<56x256xf32>
    %16 = arith.addf %10, %15 : vector<56x256xf32>
    %c6 = arith.constant 6 : index
    %c0_13 = arith.constant 0 : index
    %17 = vector.load %arg0[%c6, %c0_13] : memref<64x128xf32, #tpu.memory_space<vmem>>, vector<56x128xf32>
    %18 = arith.truncf %17 : vector<56x128xf32> to vector<56x128xbf16>
    %c3 = arith.constant 3 : index
    %c0_14 = arith.constant 0 : index
    %c0_15 = arith.constant 0 : index
    %19 = vector.load %arg1[%c3, %c0_14, %c0_15] : memref<5x128x256xbf16, #tpu.memory_space<vmem>>, vector<1x128x256xbf16>
    %20 = vector.shape_cast %19 : vector<1x128x256xbf16> to vector<128x256xbf16>
    %cst_16 = arith.constant dense<0.000000e+00> : vector<56x256xf32>
    %21 = tpu.matmul %18, %20, %cst_16 {dimension_numbers = #tpu.dot_dimension_numbers<[1], [0], [0], [1], [0, 0, 1, 1], [], []>} : vector<56x128xbf16>, vector<128x256xbf16>, vector<56x256xf32> -> vector<56x256xf32>
    %22 = arith.addf %16, %21 : vector<56x256xf32>
    %c8 = arith.constant 8 : index
    %c0_17 = arith.constant 0 : index
    %23 = vector.load %arg0[%c8, %c0_17] : memref<64x128xf32, #tpu.memory_space<vmem>>, vector<56x128xf32>
    %24 = arith.truncf %23 : vector<56x128xf32> to vector<56x128xbf16>
    %c4_18 = arith.constant 4 : index
    %c0_19 = arith.constant 0 : index
    %c0_20 = arith.constant 0 : index
    %25 = vector.load %arg1[%c4_18, %c0_19, %c0_20] : memref<5x128x256xbf16, #tpu.memory_space<vmem>>, vector<1x128x256xbf16>
    %26 = vector.shape_cast %25 : vector<1x128x256xbf16> to vector<128x256xbf16>
    %cst_21 = arith.constant dense<0.000000e+00> : vector<56x256xf32>
    %27 = tpu.matmul %24, %26, %cst_21 {dimension_numbers = #tpu.dot_dimension_numbers<[1], [0], [0], [1], [0, 0, 1, 1], [], []>} : vector<56x128xbf16>, vector<128x256xbf16>, vector<56x256xf32> -> vector<56x256xf32>
    %28 = arith.addf %22, %27 : vector<56x256xf32>
    %c0_22 = arith.constant 0 : index
    %c0_23 = arith.constant 0 : index
    %29 = vector.load %arg2[%c0_22, %c0_23] : memref<1x256xf32, #tpu.memory_space<vmem>>, vector<1x256xf32>
    %30 = vector.broadcast %29 : vector<1x256xf32> to vector<56x256xf32>
    %31 = arith.addf %28, %30 : vector<56x256xf32>
    %cst_24 = arith.constant 0.000000e+00 : f32
    %32 = vector.broadcast %cst_24 : f32 to vector<56x256xf32>
    %33 = arith.maximumf %31, %32 : vector<56x256xf32>
    %34 = arith.truncf %33 : vector<56x256xf32> to vector<56x256xbf16>
    %c0_25 = arith.constant 0 : index
    %c0_26 = arith.constant 0 : index
    %35 = vector.load %arg5[%c0_25, %c0_26] : memref<64x56xbf16, #tpu.memory_space<vmem>>, vector<64x56xbf16>
    %cst_27 = arith.constant dense<0.000000e+00> : vector<64x256xf32>
    %36 = tpu.matmul %35, %34, %cst_27 {dimension_numbers = #tpu.dot_dimension_numbers<[1], [0], [0], [1], [0, 0, 1, 1], [], []>} : vector<64x56xbf16>, vector<56x256xbf16>, vector<64x256xf32> -> vector<64x256xf32>
    %37 = vector.extract_strided_slice %36 {offsets = [0, 0], sizes = [32, 256], strides = [1, 1]} : vector<64x256xf32> to vector<32x256xf32>
    %38 = vector.extract_strided_slice %36 {offsets = [32, 0], sizes = [32, 256], strides = [1, 1]} : vector<64x256xf32> to vector<32x256xf32>
    %39 = arith.maximumf %37, %38 : vector<32x256xf32>
    %40 = vector.extract_strided_slice %39 {offsets = [0, 0], sizes = [32, 128], strides = [1, 1]} : vector<32x256xf32> to vector<32x128xf32>
    %41 = vector.extract_strided_slice %39 {offsets = [0, 128], sizes = [32, 128], strides = [1, 1]} : vector<32x256xf32> to vector<32x128xf32>
    %42 = arith.maximumf %40, %41 : vector<32x128xf32>
    %43 = vector.extract_strided_slice %42 {offsets = [0, 0], sizes = [20, 128], strides = [1, 1]} : vector<32x128xf32> to vector<20x128xf32>
    %44 = arith.truncf %43 : vector<20x128xf32> to vector<20x128xbf16>
    %c0_28 = arith.constant 0 : index
    %c0_29 = arith.constant 0 : index
    %c0_30 = arith.constant 0 : index
    %45 = vector.load %arg3[%c0_28, %c0_29, %c0_30] : memref<5x128x256xbf16, #tpu.memory_space<vmem>>, vector<1x128x256xbf16>
    %46 = vector.shape_cast %45 : vector<1x128x256xbf16> to vector<128x256xbf16>
    %cst_31 = arith.constant dense<0.000000e+00> : vector<20x256xf32>
    %47 = tpu.matmul %44, %46, %cst_31 {dimension_numbers = #tpu.dot_dimension_numbers<[1], [0], [0], [1], [0, 0, 1, 1], [], []>} : vector<20x128xbf16>, vector<128x256xbf16>, vector<20x256xf32> -> vector<20x256xf32>
    %48 = vector.extract_strided_slice %42 {offsets = [2, 0], sizes = [20, 128], strides = [1, 1]} : vector<32x128xf32> to vector<20x128xf32>
    %49 = arith.truncf %48 : vector<20x128xf32> to vector<20x128xbf16>
    %c1_32 = arith.constant 1 : index
    %c0_33 = arith.constant 0 : index
    %c0_34 = arith.constant 0 : index
    %50 = vector.load %arg3[%c1_32, %c0_33, %c0_34] : memref<5x128x256xbf16, #tpu.memory_space<vmem>>, vector<1x128x256xbf16>
    %51 = vector.shape_cast %50 : vector<1x128x256xbf16> to vector<128x256xbf16>
    %cst_35 = arith.constant dense<0.000000e+00> : vector<20x256xf32>
    %52 = tpu.matmul %49, %51, %cst_35 {dimension_numbers = #tpu.dot_dimension_numbers<[1], [0], [0], [1], [0, 0, 1, 1], [], []>} : vector<20x128xbf16>, vector<128x256xbf16>, vector<20x256xf32> -> vector<20x256xf32>
    %53 = arith.addf %47, %52 : vector<20x256xf32>
    %54 = vector.extract_strided_slice %42 {offsets = [4, 0], sizes = [20, 128], strides = [1, 1]} : vector<32x128xf32> to vector<20x128xf32>
    %55 = arith.truncf %54 : vector<20x128xf32> to vector<20x128xbf16>
    %c2_36 = arith.constant 2 : index
    %c0_37 = arith.constant 0 : index
    %c0_38 = arith.constant 0 : index
    %56 = vector.load %arg3[%c2_36, %c0_37, %c0_38] : memref<5x128x256xbf16, #tpu.memory_space<vmem>>, vector<1x128x256xbf16>
    %57 = vector.shape_cast %56 : vector<1x128x256xbf16> to vector<128x256xbf16>
    %cst_39 = arith.constant dense<0.000000e+00> : vector<20x256xf32>
    %58 = tpu.matmul %55, %57, %cst_39 {dimension_numbers = #tpu.dot_dimension_numbers<[1], [0], [0], [1], [0, 0, 1, 1], [], []>} : vector<20x128xbf16>, vector<128x256xbf16>, vector<20x256xf32> -> vector<20x256xf32>
    %59 = arith.addf %53, %58 : vector<20x256xf32>
    %60 = vector.extract_strided_slice %42 {offsets = [6, 0], sizes = [20, 128], strides = [1, 1]} : vector<32x128xf32> to vector<20x128xf32>
    %61 = arith.truncf %60 : vector<20x128xf32> to vector<20x128xbf16>
    %c3_40 = arith.constant 3 : index
    %c0_41 = arith.constant 0 : index
    %c0_42 = arith.constant 0 : index
    %62 = vector.load %arg3[%c3_40, %c0_41, %c0_42] : memref<5x128x256xbf16, #tpu.memory_space<vmem>>, vector<1x128x256xbf16>
    %63 = vector.shape_cast %62 : vector<1x128x256xbf16> to vector<128x256xbf16>
    %cst_43 = arith.constant dense<0.000000e+00> : vector<20x256xf32>
    %64 = tpu.matmul %61, %63, %cst_43 {dimension_numbers = #tpu.dot_dimension_numbers<[1], [0], [0], [1], [0, 0, 1, 1], [], []>} : vector<20x128xbf16>, vector<128x256xbf16>, vector<20x256xf32> -> vector<20x256xf32>
    %65 = arith.addf %59, %64 : vector<20x256xf32>
    %66 = vector.extract_strided_slice %42 {offsets = [8, 0], sizes = [20, 128], strides = [1, 1]} : vector<32x128xf32> to vector<20x128xf32>
    %67 = arith.truncf %66 : vector<20x128xf32> to vector<20x128xbf16>
    %c4_44 = arith.constant 4 : index
    %c0_45 = arith.constant 0 : index
    %c0_46 = arith.constant 0 : index
    %68 = vector.load %arg3[%c4_44, %c0_45, %c0_46] : memref<5x128x256xbf16, #tpu.memory_space<vmem>>, vector<1x128x256xbf16>
    %69 = vector.shape_cast %68 : vector<1x128x256xbf16> to vector<128x256xbf16>
    %cst_47 = arith.constant dense<0.000000e+00> : vector<20x256xf32>
    %70 = tpu.matmul %67, %69, %cst_47 {dimension_numbers = #tpu.dot_dimension_numbers<[1], [0], [0], [1], [0, 0, 1, 1], [], []>} : vector<20x128xbf16>, vector<128x256xbf16>, vector<20x256xf32> -> vector<20x256xf32>
    %71 = arith.addf %65, %70 : vector<20x256xf32>
    %c0_48 = arith.constant 0 : index
    %c0_49 = arith.constant 0 : index
    %72 = vector.load %arg4[%c0_48, %c0_49] : memref<1x256xf32, #tpu.memory_space<vmem>>, vector<1x256xf32>
    %73 = vector.broadcast %72 : vector<1x256xf32> to vector<20x256xf32>
    %74 = arith.addf %71, %73 : vector<20x256xf32>
    %cst_50 = arith.constant 0.000000e+00 : f32
    %75 = vector.broadcast %cst_50 : f32 to vector<20x256xf32>
    %76 = arith.maximumf %74, %75 : vector<20x256xf32>
    %77 = arith.truncf %76 : vector<20x256xf32> to vector<20x256xbf16>
    %c0_51 = arith.constant 0 : index
    %c0_52 = arith.constant 0 : index
    %78 = vector.load %arg6[%c0_51, %c0_52] : memref<32x20xbf16, #tpu.memory_space<vmem>>, vector<32x20xbf16>
    %cst_53 = arith.constant dense<0.000000e+00> : vector<32x256xf32>
    %79 = tpu.matmul %78, %77, %cst_53 {dimension_numbers = #tpu.dot_dimension_numbers<[1], [0], [0], [1], [0, 0, 1, 1], [], []>} : vector<32x20xbf16>, vector<20x256xbf16>, vector<32x256xf32> -> vector<32x256xf32>
    %80 = vector.extract_strided_slice %79 {offsets = [0, 0], sizes = [16, 256], strides = [1, 1]} : vector<32x256xf32> to vector<16x256xf32>
    %81 = vector.extract_strided_slice %79 {offsets = [16, 0], sizes = [16, 256], strides = [1, 1]} : vector<32x256xf32> to vector<16x256xf32>
    %82 = arith.maximumf %80, %81 : vector<16x256xf32>
    %83 = vector.extract_strided_slice %82 {offsets = [0, 0], sizes = [16, 128], strides = [1, 1]} : vector<16x256xf32> to vector<16x128xf32>
    %84 = vector.extract_strided_slice %82 {offsets = [0, 128], sizes = [16, 128], strides = [1, 1]} : vector<16x256xf32> to vector<16x128xf32>
    %85 = arith.maximumf %83, %84 : vector<16x128xf32>
    %86 = vector.extract_strided_slice %85 {offsets = [0, 0], sizes = [2, 128], strides = [1, 1]} : vector<16x128xf32> to vector<2x128xf32>
    %87 = arith.truncf %86 : vector<2x128xf32> to vector<2x128xbf16>
    %c0_54 = arith.constant 0 : index
    %c0_55 = arith.constant 0 : index
    %c0_56 = arith.constant 0 : index
    %88 = vector.load %arg7[%c0_54, %c0_55, %c0_56] : memref<5x128x128xbf16, #tpu.memory_space<vmem>>, vector<1x128x128xbf16>
    %89 = vector.shape_cast %88 : vector<1x128x128xbf16> to vector<128x128xbf16>
    %cst_57 = arith.constant dense<0.000000e+00> : vector<2x128xf32>
    %90 = tpu.matmul %87, %89, %cst_57 {dimension_numbers = #tpu.dot_dimension_numbers<[1], [0], [0], [1], [0, 0, 1, 1], [], []>} : vector<2x128xbf16>, vector<128x128xbf16>, vector<2x128xf32> -> vector<2x128xf32>
    %91 = vector.extract_strided_slice %85 {offsets = [2, 0], sizes = [2, 128], strides = [1, 1]} : vector<16x128xf32> to vector<2x128xf32>
    %92 = arith.truncf %91 : vector<2x128xf32> to vector<2x128xbf16>
    %c1_58 = arith.constant 1 : index
    %c0_59 = arith.constant 0 : index
    %c0_60 = arith.constant 0 : index
    %93 = vector.load %arg7[%c1_58, %c0_59, %c0_60] : memref<5x128x128xbf16, #tpu.memory_space<vmem>>, vector<1x128x128xbf16>
    %94 = vector.shape_cast %93 : vector<1x128x128xbf16> to vector<128x128xbf16>
    %cst_61 = arith.constant dense<0.000000e+00> : vector<2x128xf32>
    %95 = tpu.matmul %92, %94, %cst_61 {dimension_numbers = #tpu.dot_dimension_numbers<[1], [0], [0], [1], [0, 0, 1, 1], [], []>} : vector<2x128xbf16>, vector<128x128xbf16>, vector<2x128xf32> -> vector<2x128xf32>
    %96 = arith.addf %90, %95 : vector<2x128xf32>
    %97 = vector.extract_strided_slice %85 {offsets = [4, 0], sizes = [2, 128], strides = [1, 1]} : vector<16x128xf32> to vector<2x128xf32>
    %98 = arith.truncf %97 : vector<2x128xf32> to vector<2x128xbf16>
    %c2_62 = arith.constant 2 : index
    %c0_63 = arith.constant 0 : index
    %c0_64 = arith.constant 0 : index
    %99 = vector.load %arg7[%c2_62, %c0_63, %c0_64] : memref<5x128x128xbf16, #tpu.memory_space<vmem>>, vector<1x128x128xbf16>
    %100 = vector.shape_cast %99 : vector<1x128x128xbf16> to vector<128x128xbf16>
    %cst_65 = arith.constant dense<0.000000e+00> : vector<2x128xf32>
    %101 = tpu.matmul %98, %100, %cst_65 {dimension_numbers = #tpu.dot_dimension_numbers<[1], [0], [0], [1], [0, 0, 1, 1], [], []>} : vector<2x128xbf16>, vector<128x128xbf16>, vector<2x128xf32> -> vector<2x128xf32>
    %102 = arith.addf %96, %101 : vector<2x128xf32>
    %103 = vector.extract_strided_slice %85 {offsets = [6, 0], sizes = [2, 128], strides = [1, 1]} : vector<16x128xf32> to vector<2x128xf32>
    %104 = arith.truncf %103 : vector<2x128xf32> to vector<2x128xbf16>
    %c3_66 = arith.constant 3 : index
    %c0_67 = arith.constant 0 : index
    %c0_68 = arith.constant 0 : index
    %105 = vector.load %arg7[%c3_66, %c0_67, %c0_68] : memref<5x128x128xbf16, #tpu.memory_space<vmem>>, vector<1x128x128xbf16>
    %106 = vector.shape_cast %105 : vector<1x128x128xbf16> to vector<128x128xbf16>
    %cst_69 = arith.constant dense<0.000000e+00> : vector<2x128xf32>
    %107 = tpu.matmul %104, %106, %cst_69 {dimension_numbers = #tpu.dot_dimension_numbers<[1], [0], [0], [1], [0, 0, 1, 1], [], []>} : vector<2x128xbf16>, vector<128x128xbf16>, vector<2x128xf32> -> vector<2x128xf32>
    %108 = arith.addf %102, %107 : vector<2x128xf32>
    %109 = vector.extract_strided_slice %85 {offsets = [8, 0], sizes = [2, 128], strides = [1, 1]} : vector<16x128xf32> to vector<2x128xf32>
    %110 = arith.truncf %109 : vector<2x128xf32> to vector<2x128xbf16>
    %c4_70 = arith.constant 4 : index
    %c0_71 = arith.constant 0 : index
    %c0_72 = arith.constant 0 : index
    %111 = vector.load %arg7[%c4_70, %c0_71, %c0_72] : memref<5x128x128xbf16, #tpu.memory_space<vmem>>, vector<1x128x128xbf16>
    %112 = vector.shape_cast %111 : vector<1x128x128xbf16> to vector<128x128xbf16>
    %cst_73 = arith.constant dense<0.000000e+00> : vector<2x128xf32>
    %113 = tpu.matmul %110, %112, %cst_73 {dimension_numbers = #tpu.dot_dimension_numbers<[1], [0], [0], [1], [0, 0, 1, 1], [], []>} : vector<2x128xbf16>, vector<128x128xbf16>, vector<2x128xf32> -> vector<2x128xf32>
    %114 = arith.addf %108, %113 : vector<2x128xf32>
    %c0_74 = arith.constant 0 : index
    %c0_75 = arith.constant 0 : index
    %115 = vector.load %arg8[%c0_74, %c0_75] : memref<1x128xf32, #tpu.memory_space<vmem>>, vector<1x128xf32>
    %116 = vector.broadcast %115 : vector<1x128xf32> to vector<2x128xf32>
    %117 = arith.addf %114, %116 : vector<2x128xf32>
    %cst_76 = arith.constant 0.000000e+00 : f32
    %118 = vector.broadcast %cst_76 : f32 to vector<2x128xf32>
    %119 = arith.maximumf %117, %118 : vector<2x128xf32>
    %120 = arith.truncf %119 : vector<2x128xf32> to vector<2x128xbf16>
    %c0_77 = arith.constant 0 : index
    %c0_78 = arith.constant 0 : index
    %121 = vector.load %arg9[%c0_77, %c0_78] : memref<128x128xbf16, #tpu.memory_space<vmem>>, vector<128x128xbf16>
    %cst_79 = arith.constant dense<0.000000e+00> : vector<2x128xf32>
    %122 = tpu.matmul %120, %121, %cst_79 {dimension_numbers = #tpu.dot_dimension_numbers<[1], [0], [0], [1], [0, 0, 1, 1], [], []>} : vector<2x128xbf16>, vector<128x128xbf16>, vector<2x128xf32> -> vector<2x128xf32>
    %c0_80 = arith.constant 0 : index
    %c0_81 = arith.constant 0 : index
    %123 = vector.load %arg10[%c0_80, %c0_81] : memref<1x128xf32, #tpu.memory_space<vmem>>, vector<1x128xf32>
    %124 = vector.broadcast %123 : vector<1x128xf32> to vector<2x128xf32>
    %125 = arith.addf %122, %124 : vector<2x128xf32>
    %cst_82 = arith.constant 0.000000e+00 : f32
    %126 = vector.broadcast %cst_82 : f32 to vector<2x128xf32>
    %127 = arith.maximumf %125, %126 : vector<2x128xf32>
    %128 = arith.truncf %127 : vector<2x128xf32> to vector<2x128xbf16>
    %c0_83 = arith.constant 0 : index
    %c0_84 = arith.constant 0 : index
    %129 = vector.load %arg11[%c0_83, %c0_84] : memref<128x128xbf16, #tpu.memory_space<vmem>>, vector<128x128xbf16>
    %cst_85 = arith.constant dense<0.000000e+00> : vector<2x128xf32>
    %130 = tpu.matmul %128, %129, %cst_85 {dimension_numbers = #tpu.dot_dimension_numbers<[1], [0], [0], [1], [0, 0, 1, 1], [], []>} : vector<2x128xbf16>, vector<128x128xbf16>, vector<2x128xf32> -> vector<2x128xf32>
    %c0_86 = arith.constant 0 : index
    %c0_87 = arith.constant 0 : index
    %131 = vector.load %arg12[%c0_86, %c0_87] : memref<1x128xf32, #tpu.memory_space<vmem>>, vector<1x128xf32>
    %132 = vector.broadcast %131 : vector<1x128xf32> to vector<2x128xf32>
    %133 = arith.addf %130, %132 : vector<2x128xf32>
    %c0_88 = arith.constant 0 : index
    %c0_89 = arith.constant 0 : index
    %134 = vector.load %arg13[%c0_88, %c0_89] : memref<2x128xf32, #tpu.memory_space<vmem>>, vector<2x128xf32>
    tpu.vector_store %arg13[%c0_88, %c0_89], %133 {strides = array<i32>} : memref<2x128xf32, #tpu.memory_space<vmem>>, vector<2x128xf32>,
    return
  }
}

</mosaic_0001>

<bundles_post_ra>
// kernel: lenet_forward.1
= control target key start
LH: loop header
LB: loop body
LE: loop exit
PB: predicated region body
PF: predicated region fallthrough
CT: control target
= control target key end

     0   :  { %18 = vsyncpa [#allocation3], 0  ;;  %s4738_s0 = inlined_call_operand.vmem [shape: f32[64,128], index: 0, kind: input, shape index: {}]   ;;  %s4739_s1 = inlined_call_operand.vmem [shape: bf16[5,128,256], index: 1, kind: input, shape index: {}]   ;;  %s4740_s2 = inlined_call_operand.vmem [shape: f32[1,256], index: 2, kind: input, shape index: {}]   ;;  %s4741_s3 = inlined_call_operand.hbm [shape: bf16[5,128,256], index: 3, kind: input, shape index: {}]   ;;  %s4742_s4 = inlined_call_operand.vmem [shape: f32[1,256], index: 4, kind: input, shape index: {}]   ;;  %s4743_s5 = inlined_call_operand.vmem [shape: bf16[64,56], index: 5, kind: input, shape index: {}]   ;;  %s4744_s6 = inlined_call_operand.vmem [shape: bf16[32,20], index: 6, kind: input, shape index: {}]   ;;  %s4745_s7 = inlined_call_operand.vmem [shape: bf16[5,128,128], index: 7, kind: input, shape index: {}]   ;;  %s4746_s8 = inlined_call_operand.vmem [shape: f32[1,128], index: 8, kind: input, shape index: {}]   ;;  %s4747_s9 = inlined_call_operand.hbm [shape: bf16[128,128], index: 9, kind: input, shape index: {}]   ;;  %s4748_s10 = inlined_call_operand.vmem [shape: f32[1,128], index: 10, kind: input, shape index: {}]   ;;  %s4749_s11 = inlined_call_operand.hbm [shape: bf16[128,128], index: 11, kind: input, shape index: {}]   ;;  %s4750_s12 = inlined_call_operand.vmem [shape: f32[1,128], index: 12, kind: input, shape index: {}]   ;;  %s4751_s13 = inlined_call_operand.hbm [shape: f32[2,128], index: 13, kind: output, shape index: {}]  }
   0x1   :  { %19 = vsyncpa [#allocation6], 0 }
   0x2   :  { %20 = vsyncpa [#allocation4], 0  ;;  %s3924_s25 = smov [#allocation5]   ;;  %s3830_s29 = scalar_lea.hbm %s4747_s9, 1024 }
   0x3   :  { %s54_s26 = sshll.u32 %s3924_s25, 4  ;;  %p3831_p0 = scmp.ne.s32.totalorder %s4747_s9, %s3830_s29  ;;  %s55_s26 = int_to_ptr.vmem [resolvable:$true] %s54_s26 }
   0x4   :  { %p3834_p1 = scmp.lt.u32.totalorder %s3830_s29, %s4747_s9 }
   0x6   :  { %p3836_p2 = pnand %p3834_p1, %p3831_p0 }
   0x8   :  { %3839 = shalt.err (!%p3836_p2)
}
   0x9   :  { %s3840_s17 = scalar_lea.vmem %s55_s26, 1024  ;;  %p3845_p4 = scmp.lt.s32.totalorder %s55_s26, %s55_s26 }
   0xa   :  { %p3841_p3 = scmp.ne.s32.totalorder %s55_s26, %s3840_s17  ;;  %p3846_p5 = scmp.lt.s32.totalorder %s3840_s17, %s3840_s17 }
   0xc   :  { %p3847_p6 = por %p3846_p5, %p3845_p4 }
   0xe   :  { %p3848_p7 = pnand %p3847_p6, %p3841_p3 }
  0x10   :  { %3851 = shalt.err (!%p3848_p7)
}
  0x11   :  { %s3925_s18 = smov 64   ;;  %s3926_s19 = smov 4  }
  0x12   :  { %60 = dma.hbm_to_vmem [thread:$0]  %s4747_s9, 1024, %s55_s26, [#allocation6], %s3925_s18, %s3925_s18, %s3926_s19  }
  0x13   :  { %s3927_s22 = smov [#allocation2]   ;;  %s3852_s27 = scalar_lea.hbm %s4741_s3, 10240 }
  0x14   :  { %s32_s23 = sshll.u32 %s3927_s22, 4  ;;  %p3853_p8 = scmp.ne.s32.totalorder %s4741_s3, %s3852_s27  ;;  %s33_s23 = int_to_ptr.vmem [resolvable:$true] %s32_s23 }
  0x15   :  { %p3856_p9 = scmp.lt.u32.totalorder %s3852_s27, %s4741_s3 }
  0x17   :  { %p3858_p10 = pnand %p3856_p9, %p3853_p8 }
  0x19   :  { %3861 = shalt.err (!%p3858_p10)
}
  0x1a   :  { %s3862_s15 = scalar_lea.vmem %s33_s23, 10240  ;;  %p3867_p12 = scmp.lt.s32.totalorder %s33_s23, %s33_s23 }
  0x1b   :  { %p3863_p11 = scmp.ne.s32.totalorder %s33_s23, %s3862_s15  ;;  %p3868_p13 = scmp.lt.s32.totalorder %s3862_s15, %s3862_s15 }
  0x1d   :  { %p3869_p0 = por %p3868_p13, %p3867_p12 }
  0x1f   :  { %p3870_p1 = pnand %p3869_p0, %p3863_p11 }
  0x21   :  { %3873 = shalt.err (!%p3870_p1)
}
  0x22   :  { %s3928_s9 = smov 128   ;;  %s3929_s26 = smov 8  }
  0x23   :  { %38 = dma.hbm_to_vmem [thread:$0]  %s4741_s3, 10240, %s33_s23, [#allocation3], %s3928_s9, %s3928_s9, %s3929_s26  }
  0x24   :  { %s3930_s20 = smov [#allocation7]   ;;  %s3874_s25 = scalar_lea.hbm %s4749_s11, 1024 }
  0x25   :  { %s68_s21 = sshll.u32 %s3930_s20, 4  ;;  %p3875_p2 = scmp.ne.s32.totalorder %s4749_s11, %s3874_s25  ;;  %s69_s21 = int_to_ptr.vmem [resolvable:$true] %s68_s21 }
  0x26   :  { %p3878_p3 = scmp.lt.u32.totalorder %s3874_s25, %s4749_s11 }
  0x28   :  { %p3880_p4 = pnand %p3878_p3, %p3875_p2 }
  0x2a   :  { %3883 = shalt.err (!%p3880_p4)
}
  0x2b   :  { %s3884_s14 = scalar_lea.vmem %s69_s21, 1024  ;;  %p3889_p6 = scmp.lt.s32.totalorder %s69_s21, %s69_s21 }
  0x2c   :  { %p3885_p5 = scmp.ne.s32.totalorder %s69_s21, %s3884_s14  ;;  %p3890_p7 = scmp.lt.s32.totalorder %s3884_s14, %s3884_s14 }
  0x2e   :  { %p3891_p8 = por %p3890_p7, %p3889_p6 }
  0x30   :  { %p3892_p9 = pnand %p3891_p8, %p3885_p5 }
  0x32   :  { %3895 = shalt.err (!%p3892_p9)
}
  0x33   :  { %74 = dma.hbm_to_vmem [thread:$0]  %s4749_s11, 1024, %s69_s21, [#allocation6], %s3925_s18, %s3925_s18, %s3926_s19  }
  0x34   :  { %3918 = dma.done.wait [#allocation3], 10240  }
  0x35   :  { %3919 = vsyncadd [#allocation3], 4294957056 }
  0x36   :  { %3920 = dma.done.wait [#allocation6], 2048  }
  0x37   :  { %3921 = vsyncadd [#allocation6], 4294965248  ;;  %v3931_v0 = vmov 0   ;;  %v3528_v1 = vld [vmem:[%s4739_s1 + $0x84] ss:$8 sps:$4 sm:$0xff]   ;;  %v4114_v22 = vld [vmem:[%s4738_s0 + $0x10] sm:$0xff] }
  0x38   :  { %254 = vmatprep.mubr.bf16.mxu0 %v3931_v0  ;;  %1151 = vmatprep.mubr.bf16.mxu1 %v3931_v0  ;;  %v3530_v2 = vld [vmem:[%s4739_s1 + $0x80] ss:$8 sps:$4 sm:$0xff]   ;;  %v3531_v3 = vld [vmem:[%s4739_s1 + $0x94] ss:$8 sps:$4 sm:$0xff]   ;;  %v3533_v4 = vld [vmem:[%s4739_s1 + $0x90] ss:$8 sps:$4 sm:$0xff]  }
  0x39   :  { %222 = vmatprep.subr.bf16.mxu0 %v3528_v1  ;;  %v3534_v5 = vld [vmem:[%s4739_s1 + $0xa4] ss:$8 sps:$4 sm:$0xff]   ;;  %v3536_v6 = vld [vmem:[%s4739_s1 + $0xa0] ss:$8 sps:$4 sm:$0xff]   ;;  %v3537_v7 = vld [vmem:[%s4739_s1 + $0xb4] ss:$8 sps:$4 sm:$0xff]  }
  0x3a   :  { %223 = vmatpush1.bf16.msra.mxu0 %v3530_v2  ;;  %v3539_v8 = vld [vmem:[%s4739_s1 + $0xb0] ss:$8 sps:$4 sm:$0xff]   ;;  %v3540_v9 = vld [vmem:[%s4739_s1 + $0xc4] ss:$8 sps:$4 sm:$0xff]   ;;  %v3542_v10 = vld [vmem:[%s4739_s1 + $0xc0] ss:$8 sps:$4 sm:$0xff]  }
  0x3b   :  { %224 = vmatprep.subr.bf16.mxu0 %v3531_v3  ;;  %v3543_v11 = vld [vmem:[%s4739_s1 + $0xd4] ss:$8 sps:$4 sm:$0xff]   ;;  %v3545_v12 = vld [vmem:[%s4739_s1 + $0xd0] ss:$8 sps:$4 sm:$0xff]   ;;  %v3546_v13 = vld [vmem:[%s4739_s1 + $0xe4] ss:$8 sps:$4 sm:$0xff]  }
  0x3c   :  { %v3548_v14 = vld [vmem:[%s4739_s1 + $0xe0] ss:$8 sps:$4 sm:$0xff]   ;;  %v3549_v15 = vld [vmem:[%s4739_s1 + $0xf4] ss:$8 sps:$4 sm:$0xff]   ;;  %v3551_v16 = vld [vmem:[%s4739_s1 + $0xf0] ss:$8 sps:$4 sm:$0xff]  }
  0x3d   :  { %v114_v17 = vld [vmem:[%s4738_s0 + $0x2] sm:$0xff]  ;;  %v115_v18 = vld [vmem:[%s4738_s0 + $0xa] sm:$0xff]  ;;  %v3557_v25 = vld [vmem:[%s4739_s1 + $0x14] ss:$8 sps:$4 sm:$0xff]   ;;  %vm1112_vm0 = vcmask 1043456   ;;  %vm1099_vm1 = vcmask 457728  }
  0x3e   :  { %225 = vmatpush1.bf16.msra.mxu0 %v3533_v4  ;;  %v3554_v19 = vld [vmem:[%s4739_s1 + $0x4] ss:$8 sps:$4 sm:$0xff]   ;;  %v121_v20 = vpack.c.bf16 %v115_v18, %v114_v17  ;;  %v3552_v23 = vld [vmem:[%s4739_s1] ss:$8 sps:$4 sm:$0xff]   ;;  %v3555_v26 = vld [vmem:[%s4739_s1 + $0x10] ss:$8 sps:$4 sm:$0xff]  }
  0x3f   :  { %226 = vmatprep.subr.bf16.mxu0 %v3534_v5  ;;  %v4109_v21 = vld [vmem:[%s4738_s0 + $0x8] sm:$0xff]  ;;  %v116_v27 = vld [vmem:[%s4738_s0 + $0x12] sm:$0xff]  ;;  %v4138_v29 = vld [vmem:[%s4738_s0 + $0x20] sm:$0xff]  ;;  %vm1241_vm2 = vcmask 1046528   ;;  %vm1526_vm3 = vcmask 1045504   ;;  %vm1688_vm4 = vcmask 1044480  }
  0x40   :  { %v837_v24 = vpack.c.bf16 %v4114_v22, %v4109_v21  ;;  %v4133_v28 = vld [vmem:[%s4738_s0 + $0x18] sm:$0xff]  ;;  %v3560_v32 = vld [vmem:[%s4739_s1 + $0x24] ss:$8 sps:$4 sm:$0xff]   ;;  %v3558_v34 = vld [vmem:[%s4739_s1 + $0x20] ss:$8 sps:$4 sm:$0xff]   ;;  %vm2036_vm5 = vcmask 1041408  }
  0x41   :  { %v117_v30 = vld [vmem:[%s4738_s0 + $0x1a] sm:$0xff]  ;;  %v838_v31 = vpack.c.bf16 %v4138_v29, %v4133_v28  ;;  %v4158_v36 = vld [vmem:[%s4738_s0 + $0x28] sm:$0xff]  ;;  %v4163_v37 = vld [vmem:[%s4738_s0 + $0x30] sm:$0xff]  ;;  %v95_v61 = vpack.c.bf16 %v4133_v28, %v4114_v22  ;;  %vm2029_vm6 = vcmask 162816   ;;  %vm3933_vm7 = vmmov 0  }
  0x42   :  { %227 = vmatpush1.bf16.msra.mxu0 %v3536_v6  ;;  %v122_v33 = vpack.c.bf16 %v117_v30, %v116_v27  ;;  %v3563_v35 = vld [vmem:[%s4739_s1 + $0x34] ss:$8 sps:$4 sm:$0xff]   ;;  %v3561_v38 = vld [vmem:[%s4739_s1 + $0x30] ss:$8 sps:$4 sm:$0xff]   ;;  %v118_v39 = vld [vmem:[%s4738_s0 + $0x22] sm:$0xff]  ;;  %v839_v41 = vpack.c.bf16 %v4163_v37, %v4158_v36  ;;  %v96_v3 = vpack.c.bf16 %v4158_v36, %v4138_v29 }
  0x43   :  { %228 = vmatprep.subr.bf16.mxu0 %v3537_v7  ;;  %v119_v40 = vld [vmem:[%s4738_s0 + $0x2a] sm:$0xff]  ;;  %v3569_v45 = vld [vmem:[%s4739_s1 + $0x54] ss:$8 sps:$4 sm:$0xff]   ;;  %v87_v53 = vld [vmem:[%s4738_s0] sm:$0xff] }
  0x44   :  { %v3566_v42 = vld [vmem:[%s4739_s1 + $0x44] ss:$8 sps:$4 sm:$0xff]   ;;  %v123_v43 = vpack.c.bf16 %v119_v40, %v118_v39  ;;  %v3564_v44 = vld [vmem:[%s4739_s1 + $0x40] ss:$8 sps:$4 sm:$0xff]   ;;  %v3567_v46 = vld [vmem:[%s4739_s1 + $0x50] ss:$8 sps:$4 sm:$0xff]   ;;  %v94_v55 = vpack.c.bf16 %v4109_v21, %v87_v53 }
  0x45   :  { %v120_v47 = vld [vmem:[%s4738_s0 + $0x32] sm:$0xff]  ;;  %v3572_v48 = vld [vmem:[%s4739_s1 + $0x64] ss:$8 sps:$4 sm:$0xff]   ;;  %v3570_v50 = vld [vmem:[%s4739_s1 + $0x60] ss:$8 sps:$4 sm:$0xff]  }
  0x46   :  { %229 = vmatpush1.bf16.msra.mxu0 %v3539_v8  ;;  %v124_v49 = vpack.c.bf16 %v120_v47, %v120_v47  ;;  %v3575_v51 = vld [vmem:[%s4739_s1 + $0x74] ss:$8 sps:$4 sm:$0xff]   ;;  %v3573_v52 = vld [vmem:[%s4739_s1 + $0x70] ss:$8 sps:$4 sm:$0xff]   ;;  %v3578_v54 = vld [vmem:[%s4739_s1 + $0x104] ss:$8 sps:$4 sm:$0xff]   ;;  %v97_v8 = vpack.c.bf16 %v4163_v37, %v4163_v37 }
  0x47   :  { %230 = vmatprep.subr.bf16.mxu0 %v3540_v9  ;;  %v3576_v56 = vld [vmem:[%s4739_s1 + $0x100] ss:$8 sps:$4 sm:$0xff]   ;;  %v3581_v57 = vld [vmem:[%s4739_s1 + $0x114] ss:$8 sps:$4 sm:$0xff]   ;;  %v3579_v58 = vld [vmem:[%s4739_s1 + $0x110] ss:$8 sps:$4 sm:$0xff]  }
  0x48   :  { %v3584_v59 = vld [vmem:[%s4739_s1 + $0x124] ss:$8 sps:$4 sm:$0xff]   ;;  %v3582_v60 = vld [vmem:[%s4739_s1 + $0x120] ss:$8 sps:$4 sm:$0xff]   ;;  %v3587_v62 = vld [vmem:[%s4739_s1 + $0x134] ss:$8 sps:$4 sm:$0xff]  }
  0x49   :  { %v3585_v63 = vld [vmem:[%s4739_s1 + $0x130] ss:$8 sps:$4 sm:$0xff]   ;;  %v3590_v1 = vld [vmem:[%s4739_s1 + $0x144] ss:$8 sps:$4 sm:$0xff]   ;;  %v3588_v2 = vld [vmem:[%s4739_s1 + $0x140] ss:$8 sps:$4 sm:$0xff]  }
  0x4a   :  { %231 = vmatpush1.bf16.msra.mxu0 %v3542_v10  ;;  %v3593_v4 = vld [vmem:[%s4739_s1 + $0x154] ss:$8 sps:$4 sm:$0xff]   ;;  %v3591_v5 = vld [vmem:[%s4739_s1 + $0x150] ss:$8 sps:$4 sm:$0xff]   ;;  %v3596_v6 = vld [vmem:[%s4739_s1 + $0x164] ss:$8 sps:$4 sm:$0xff]  }
  0x4b   :  { %232 = vmatprep.subr.bf16.mxu0 %v3543_v11  ;;  %v3594_v7 = vld [vmem:[%s4739_s1 + $0x160] ss:$8 sps:$4 sm:$0xff]   ;;  %v3599_v9 = vld [vmem:[%s4739_s1 + $0x174] ss:$8 sps:$4 sm:$0xff]   ;;  %v3597_v10 = vld [vmem:[%s4739_s1 + $0x170] ss:$8 sps:$4 sm:$0xff]  }
  0x4c   :  { %v444_v11 = vld [vmem:[%s4738_s0 + $0x4] sm:$0xff]  ;;  %v3603_v17 = vld [vmem:[%s4739_s1 + $0x190] ss:$8 sps:$4 sm:$0xff]  }
  0x4d   :  { %v446_v18 = vld [vmem:[%s4738_s0 + $0x14] sm:$0xff]  ;;  %v448_v30 = vld [vmem:[%s4738_s0 + $0x24] sm:$0xff] }
  0x4e   :  { %233 = vmatpush1.bf16.msra.mxu0 %v3545_v12  ;;  %v445_v12 = vld [vmem:[%s4738_s0 + $0xc] sm:$0xff]  ;;  %v450_v40 = vld [vmem:[%s4738_s0 + $0x34] sm:$0xff] }
  0x4f   :  { %234 = vmatprep.subr.bf16.mxu0 %v3546_v13  ;;  %v3602_v13 = vld [vmem:[%s4739_s1 + $0x184] ss:$8 sps:$4 sm:$0xff]   ;;  %v3609_v27 = vld [vmem:[%s4739_s1 + $0x1b0] ss:$8 sps:$4 sm:$0xff]  }
  0x50   :  { %v3615_v39 = vld [vmem:[%s4739_s1 + $0x1d0] ss:$8 sps:$4 sm:$0xff]   ;;  %v637_v47 = vld [vmem:[%s4738_s0 + $0x6] sm:$0xff] }
  0x51   :  { %v3627_v53 = vld [vmem:[%s4739_s1 + $0x210] ss:$8 sps:$4 sm:$0xff]  }
  0x52   :  { %235 = vmatpush1.bf16.msra.mxu0 %v3548_v14  ;;  %v3600_v14 = vld [vmem:[%s4739_s1 + $0x180] ss:$8 sps:$4 sm:$0xff]  }
  0x53   :  { %236 = vmatprep.subr.bf16.mxu0 %v3549_v15  ;;  %v451_v15 = vpack.c.bf16 %v445_v12, %v444_v11  ;;  %v836_v11 = vld [vmem:[%s4738_s0 + $0x38] sm:$0xff] }
  0x54   :  { %v840_v21 = vpack.c.bf16 %v836_v11, %v836_v11 }
  0x56   :  { %237 = vmatpush1.bf16.msra.mxu0 %v3551_v16  ;;  %v3605_v16 = vld [vmem:[%s4739_s1 + $0x194] ss:$8 sps:$4 sm:$0xff]  }
  0x57   :  { %373 = vmatprep.subr.bf16.mxu0 %v3554_v19  ;;  %v447_v19 = vld [vmem:[%s4738_s0 + $0x1c] sm:$0xff] }
  0x59   :  { %255 = vmatmul.mubr.bf16.vlgmr.msra.gmra.mrb[0].mxu0 %v121_v20  ;;  %v3608_v20 = vld [vmem:[%s4739_s1 + $0x1a4] ss:$8 sps:$4 sm:$0xff]  }
  0x5a   :  { %374 = vmatpush1.bf16.msra.mxu0 %v3552_v23  ;;  %264 = vmatprep.mubr.bf16.mxu0 %v3931_v0  ;;  %v3606_v23 = vld [vmem:[%s4739_s1 + $0x1a0] ss:$8 sps:$4 sm:$0xff]  }
  0x5b   :  { %375 = vmatprep.subr.bf16.mxu0 %v3557_v25  ;;  %v452_v25 = vpack.c.bf16 %v447_v19, %v446_v18 }
  0x5e   :  { %376 = vmatpush1.bf16.msra.mxu0 %v3555_v26  ;;  %v3611_v26 = vld [vmem:[%s4739_s1 + $0x1b4] ss:$8 sps:$4 sm:$0xff]  }
  0x5f   :  { %377 = vmatprep.subr.bf16.mxu0 %v3560_v32  ;;  %v449_v32 = vld [vmem:[%s4738_s0 + $0x2c] sm:$0xff] }
  0x61   :  { %265 = vmatmul.mubr.bf16.gmra.mrb[4].mxu0 %v122_v33  ;;  %v3614_v33 = vld [vmem:[%s4739_s1 + $0x1c4] ss:$8 sps:$4 sm:$0xff]  }
  0x62   :  { %378 = vmatpush1.bf16.msra.mxu0 %v3558_v34  ;;  %274 = vmatprep.mubr.bf16.mxu0 %v3931_v0  ;;  %v3612_v34 = vld [vmem:[%s4739_s1 + $0x1c0] ss:$8 sps:$4 sm:$0xff]  }
  0x63   :  { %379 = vmatprep.subr.bf16.mxu0 %v3563_v35  ;;  %v453_v35 = vpack.c.bf16 %v449_v32, %v448_v30 }
  0x66   :  { %380 = vmatpush1.bf16.msra.mxu0 %v3561_v38  ;;  %v3617_v38 = vld [vmem:[%s4739_s1 + $0x1d4] ss:$8 sps:$4 sm:$0xff]  }
  0x67   :  { %381 = vmatprep.subr.bf16.mxu0 %v3566_v42  ;;  %v3620_v42 = vld [vmem:[%s4739_s1 + $0x1e4] ss:$8 sps:$4 sm:$0xff]  }
  0x69   :  { %275 = vmatmul.mubr.bf16.gmra.mrb[8].mxu0 %v123_v43  ;;  %v3618_v43 = vld [vmem:[%s4739_s1 + $0x1e0] ss:$8 sps:$4 sm:$0xff]  }
  0x6a   :  { %382 = vmatpush1.bf16.msra.mxu0 %v3564_v44  ;;  %284 = vmatprep.mubr.bf16.mxu0 %v3931_v0  ;;  %v454_v44 = vpack.c.bf16 %v450_v40, %v450_v40 }
  0x6b   :  { %383 = vmatprep.subr.bf16.mxu0 %v3569_v45  ;;  %v3623_v45 = vld [vmem:[%s4739_s1 + $0x1f4] ss:$8 sps:$4 sm:$0xff]  }
  0x6e   :  { %384 = vmatpush1.bf16.msra.mxu0 %v3567_v46  ;;  %v3621_v46 = vld [vmem:[%s4739_s1 + $0x1f0] ss:$8 sps:$4 sm:$0xff]  }
  0x6f   :  { %385 = vmatprep.subr.bf16.mxu0 %v3572_v48  ;;  %v638_v48 = vld [vmem:[%s4738_s0 + $0xe] sm:$0xff] }
  0x71   :  { %285 = vmatmul.mubr.bf16.gmra.mrb[12].mxu0 %v124_v49  ;;  %v3626_v49 = vld [vmem:[%s4739_s1 + $0x204] ss:$8 sps:$4 sm:$0xff]  }
  0x72   :  { %386 = vmatpush1.bf16.msra.mxu0 %v3570_v50  ;;  %405 = vmatprep.mubr.bf16.mxu0 %v3931_v0  ;;  %v3624_v50 = vld [vmem:[%s4739_s1 + $0x200] ss:$8 sps:$4 sm:$0xff]  }
  0x73   :  { %387 = vmatprep.subr.bf16.mxu0 %v3575_v51  ;;  %v644_v51 = vpack.c.bf16 %v638_v48, %v637_v47 }
  0x76   :  { %388 = vmatpush1.bf16.msra.mxu0 %v3573_v52  ;;  %v3629_v52 = vld [vmem:[%s4739_s1 + $0x214] ss:$8 sps:$4 sm:$0xff]  }
  0x77   :  { %552 = vmatprep.subr.bf16.mxu0 %v3578_v54  ;;  %v639_v54 = vld [vmem:[%s4738_s0 + $0x16] sm:$0xff] }
  0x79   :  { %406 = vmatmul.mubr.bf16.vlgmr.msra.gmra.mrb[0].mxu0 %v94_v55  ;;  %v640_v55 = vld [vmem:[%s4738_s0 + $0x1e] sm:$0xff] }
  0x7a   :  { %553 = vmatpush1.bf16.msra.mxu0 %v3576_v56  ;;  %415 = vmatprep.mubr.bf16.mxu0 %v3931_v0  ;;  %v3632_v56 = vld [vmem:[%s4739_s1 + $0x224] ss:$8 sps:$4 sm:$0xff]  }
  0x7b   :  { %554 = vmatprep.subr.bf16.mxu0 %v3581_v57  ;;  %v645_v57 = vpack.c.bf16 %v640_v55, %v639_v54 }
  0x7e   :  { %555 = vmatpush1.bf16.msra.mxu0 %v3579_v58  ;;  %v3630_v58 = vld [vmem:[%s4739_s1 + $0x220] ss:$8 sps:$4 sm:$0xff]  }
  0x7f   :  { %556 = vmatprep.subr.bf16.mxu0 %v3584_v59  ;;  %v3635_v59 = vld [vmem:[%s4739_s1 + $0x234] ss:$8 sps:$4 sm:$0xff]  }
  0x81   :  { %416 = vmatmul.mubr.bf16.gmra.mrb[4].mxu0 %v95_v61  ;;  %v641_v61 = vld [vmem:[%s4738_s0 + $0x26] sm:$0xff] }
  0x82   :  { %557 = vmatpush1.bf16.msra.mxu0 %v3582_v60  ;;  %425 = vmatprep.mubr.bf16.mxu0 %v3931_v0  ;;  %v3633_v60 = vld [vmem:[%s4739_s1 + $0x230] ss:$8 sps:$4 sm:$0xff]  }
  0x83   :  { %558 = vmatprep.subr.bf16.mxu0 %v3587_v62  ;;  %v642_v62 = vld [vmem:[%s4738_s0 + $0x2e] sm:$0xff] }
  0x86   :  { %559 = vmatpush1.bf16.msra.mxu0 %v3585_v63  ;;  %v3638_v63 = vld [vmem:[%s4739_s1 + $0x244] ss:$8 sps:$4 sm:$0xff]  }
  0x87   :  { %560 = vmatprep.subr.bf16.mxu0 %v3590_v1  ;;  %v646_v1 = vpack.c.bf16 %v642_v62, %v641_v61 }
  0x89   :  { %426 = vmatmul.mubr.bf16.gmra.mrb[8].mxu0 %v96_v3  ;;  %v3641_v3 = vld [vmem:[%s4739_s1 + $0x254] ss:$8 sps:$4 sm:$0xff]  }
  0x8a   :  { %561 = vmatpush1.bf16.msra.mxu0 %v3588_v2  ;;  %435 = vmatprep.mubr.bf16.mxu0 %v3931_v0  ;;  %v3636_v2 = vld [vmem:[%s4739_s1 + $0x240] ss:$8 sps:$4 sm:$0xff]  }
  0x8b   :  { %562 = vmatprep.subr.bf16.mxu0 %v3593_v4  ;;  %v3639_v4 = vld [vmem:[%s4739_s1 + $0x250] ss:$8 sps:$4 sm:$0xff]  }
  0x8e   :  { %563 = vmatpush1.bf16.msra.mxu0 %v3591_v5  ;;  %v643_v5 = vld [vmem:[%s4738_s0 + $0x36] sm:$0xff] }
  0x8f   :  { %564 = vmatprep.subr.bf16.mxu0 %v3596_v6  ;;  %v3644_v6 = vld [vmem:[%s4739_s1 + $0x264] ss:$8 sps:$4 sm:$0xff]  }
  0x91   :  { %436 = vmatmul.mubr.bf16.gmra.mrb[16].mxu0 %v97_v8  ;;  %v3642_v8 = vld [vmem:[%s4739_s1 + $0x260] ss:$8 sps:$4 sm:$0xff]  }
  0x92   :  { %565 = vmatpush1.bf16.msra.mxu0 %v3594_v7  ;;  %584 = vmatprep.mubr.bf16.mxu0 %v3931_v0  ;;  %v647_v7 = vpack.c.bf16 %v643_v5, %v643_v5 }
  0x93   :  { %566 = vmatprep.subr.bf16.mxu0 %v3599_v9  ;;  %v3647_v9 = vld [vmem:[%s4739_s1 + $0x274] ss:$8 sps:$4 sm:$0xff]  }
  0x96   :  { %567 = vmatpush1.bf16.msra.mxu0 %v3597_v10  ;;  %v3645_v10 = vld [vmem:[%s4739_s1 + $0x270] ss:$8 sps:$4 sm:$0xff]  }
  0x97   :  { %745 = vmatprep.subr.bf16.mxu0 %v3602_v13 }
  0x99   :  { %585 = vmatmul.mubr.bf16.vlgmr.msra.gmra.mrb[0].mxu0 %v451_v15 }
  0x9a   :  { %746 = vmatpush1.bf16.msra.mxu0 %v3600_v14  ;;  %594 = vmatprep.mubr.bf16.mxu0 %v3931_v0 }
  0x9b   :  { %747 = vmatprep.subr.bf16.mxu0 %v3605_v16 }
  0x9e   :  { %748 = vmatpush1.bf16.msra.mxu0 %v3603_v17 }
  0x9f   :  { %749 = vmatprep.subr.bf16.mxu0 %v3608_v20  ;;  %v1025_v20 = vlaneseq }
  0xa1   :  { %595 = vmatmul.mubr.bf16.gmra.mrb[4].mxu0 %v452_v25 }
  0xa2   :  { %750 = vmatpush1.bf16.msra.mxu0 %v3606_v23  ;;  %604 = vmatprep.mubr.bf16.mxu0 %v3931_v0  ;;  %v4430_v23 = vshrl.u32 %v1025_v20, 7 }
  0xa3   :  { %751 = vmatprep.subr.bf16.mxu0 %v3611_v26 }
  0xa4   :  { %v1027_v30 = vsub.s32 0, %v4430_v23 }
  0xa6   :  { %752 = vmatpush1.bf16.msra.mxu0 %v3609_v27 }
  0xa7   :  { %753 = vmatprep.subr.bf16.mxu0 %v3614_v33 }
  0xa9   :  { %605 = vmatmul.mubr.bf16.gmra.mrb[8].mxu0 %v453_v35  ;;  %v1031_v35 = vsub.s32 1, %v4430_v23 }
  0xaa   :  { %754 = vmatpush1.bf16.msra.mxu0 %v3612_v34  ;;  %614 = vmatprep.mubr.bf16.mxu0 %v3931_v0  ;;  %v1023_v34 = vld [vmem:[%s4740_s2] sm:$0x3] }
  0xab   :  { %755 = vmatprep.subr.bf16.mxu0 %v3617_v38  ;;  %v1032_v40 = vrot.slane %v1023_v34, %v1031_v35 }
  0xae   :  { %756 = vmatpush1.bf16.msra.mxu0 %v3615_v39  ;;  %v1028_v39 = vrot.slane %v1023_v34, %v1027_v30 }
  0xaf   :  { %757 = vmatprep.subr.bf16.mxu0 %v3620_v42 }
  0xb1   :  { %615 = vmatmul.mubr.bf16.gmra.mrb[20].mxu0 %v454_v44 }
  0xb2   :  { %758 = vmatpush1.bf16.msra.mxu0 %v3618_v43  ;;  %777 = vmatprep.mubr.bf16.mxu0 %v3931_v0 }
  0xb3   :  { %759 = vmatprep.subr.bf16.mxu0 %v3623_v45 }
  0xb6   :  { %760 = vmatpush1.bf16.msra.mxu0 %v3621_v46 }
  0xb7   :  { %938 = vmatprep.subr.bf16.mxu0 %v3626_v49 }
  0xb9   :  { %778 = vmatmul.mubr.bf16.vlgmr.msra.gmra.mrb[0].mxu0 %v644_v51 }
  0xba   :  { %939 = vmatpush1.bf16.msra.mxu0 %v3624_v50  ;;  %787 = vmatprep.mubr.bf16.mxu0 %v3931_v0 }
  0xbb   :  { %940 = vmatprep.subr.bf16.mxu0 %v3629_v52 }
  0xbe   :  { %941 = vmatpush1.bf16.msra.mxu0 %v3627_v53 }
  0xbf   :  { %942 = vmatprep.subr.bf16.mxu0 %v3632_v56 }
  0xc1   :  { %788 = vmatmul.mubr.bf16.gmra.mrb[4].mxu0 %v645_v57 }
  0xc2   :  { %943 = vmatpush1.bf16.msra.mxu0 %v3630_v58  ;;  %797 = vmatprep.mubr.bf16.mxu0 %v3931_v0 }
  0xc3   :  { %944 = vmatprep.subr.bf16.mxu0 %v3635_v59 }
  0xc6   :  { %945 = vmatpush1.bf16.msra.mxu0 %v3633_v60 }
  0xc7   :  { %946 = vmatprep.subr.bf16.mxu0 %v3638_v63 }
  0xc9   :  { %798 = vmatmul.mubr.bf16.gmra.mrb[8].mxu0 %v646_v1 }
  0xca   :  { %947 = vmatpush1.bf16.msra.mxu0 %v3636_v2  ;;  %807 = vmatprep.mubr.bf16.mxu0 %v3931_v0 }
  0xcb   :  { %948 = vmatprep.subr.bf16.mxu0 %v3641_v3 }
  0xce   :  { %949 = vmatpush1.bf16.msra.mxu0 %v3639_v4 }
  0xcf   :  { %950 = vmatprep.subr.bf16.mxu0 %v3644_v6 }
  0xd1   :  { %808 = vmatmul.mubr.bf16.gmra.mrb[24].mxu0 %v647_v7 }
  0xd2   :  { %951 = vmatpush1.bf16.msra.mxu0 %v3642_v8  ;;  %970 = vmatprep.mubr.bf16.mxu0 %v3931_v0 }
  0xd3   :  { %952 = vmatprep.subr.bf16.mxu0 %v3647_v9 }
  0xd6   :  { %953 = vmatpush1.bf16.msra.mxu0 %v3645_v10 }
  0xd9   :  { %971 = vmatmul.mubr.bf16.vlgmr.msra.gmra.mrb[0].mxu0 %v837_v24 }
  0xda   :  { %980 = vmatprep.mubr.bf16.mxu0 %v3931_v0 }
  0xe1   :  { %981 = vmatmul.mubr.bf16.gmra.mrb[4].mxu0 %v838_v31 }
  0xe2   :  { %990 = vmatprep.mubr.bf16.mxu0 %v3931_v0 }
  0xe9   :  { %991 = vmatmul.mubr.bf16.gmra.mrb[8].mxu0 %v839_v41 }
  0xea   :  { %1000 = vmatprep.mubr.bf16.mxu0 %v3931_v0 }
  0xf1   :  { %1001 = vmatmul.mubr.bf16.gmra.mrb[28].mxu0 %v840_v21 }
  0xf2   :  { %2075 = vmatprep.mubr.bf16.mxu0 %v3931_v0 }
 0x144   :  { %v286_v22 = vpop.f32.mrb[12].mxu0 }
 0x145   :  { %v288_v24 = vpop.f32.mrb[13].mxu0 }
 0x146   :  { %v290_v28 = vpop.f32.mrb[14].mxu0 }
 0x147   :  { %v291_v29 = vpop.f32.mrb[15].mxu0 }
 0x164   :  { %v437_v31 = vpop.f32.mrb[16].mxu0 }
 0x165   :  { %v438_v12 = vadd.f32 %v437_v31, %v286_v22  ;;  %v439_v13 = vpop.f32.mrb[17].mxu0 }
 0x166   :  { %v440_v14 = vadd.f32 %v439_v13, %v288_v24  ;;  %v441_v36 = vpop.f32.mrb[18].mxu0 }
 0x167   :  { %v442_v37 = vpop.f32.mrb[19].mxu0 }
 0x184   :  { %v616_v41 = vpop.f32.mrb[20].mxu0 }
 0x185   :  { %v635_v15 = vadd.f32 %v616_v41, %v438_v12  ;;  %v618_v16 = vpop.f32.mrb[21].mxu0 }
 0x186   :  { %v636_v17 = vadd.f32 %v618_v16, %v440_v14  ;;  %v620_v18 = vpop.f32.mrb[22].mxu0 }
 0x187   :  { %v621_v19 = vpop.f32.mrb[23].mxu0 }
 0x1a4   :  { %v809_v25 = vpop.f32.mrb[24].mxu0 }
 0x1a5   :  { %v828_v26 = vadd.f32 %v809_v25, %v635_v15  ;;  %v811_v27 = vpop.f32.mrb[25].mxu0 }
 0x1a6   :  { %v829_v32 = vadd.f32 %v811_v27, %v636_v17  ;;  %v813_v33 = vpop.f32.mrb[26].mxu0 }
 0x1a7   :  { %v814_v38 = vpop.f32.mrb[27].mxu0 }
 0x1a8   :  { %v3648_v38 = vld [vmem:[%s4743_s5] sm:$0xff]  }
 0x1ac   :  { %v972_v42 = vpop.f32.mrb[0].mxu0 }
 0x1ad   :  { %v1035_v43 = vadd.f32 %v1028_v39, %v972_v42  ;;  %v974_v44 = vpop.f32.mrb[1].mxu0  ;;  %v3652_v42 = vld [vmem:[#allocation2 + $0x80] ss:$8 sps:$4 sm:$0xff]  }
 0x1ae   :  { %v1036_v45 = vadd.f32 %v1032_v40, %v974_v44  ;;  %v976_v46 = vpop.f32.mrb[2].mxu0  ;;  %v3657_v44 = vld [vmem:[#allocation2 + $0x94] ss:$8 sps:$4 sm:$0xff]  }
 0x1af   :  { %v1037_v47 = vadd.f32 %v1028_v39, %v976_v46  ;;  %v978_v48 = vpop.f32.mrb[3].mxu0  ;;  %v1049_v50 = vmax.f32 %v1035_v43, 0.0  ;;  %v3655_v43 = vld [vmem:[#allocation2 + $0x90] ss:$8 sps:$4 sm:$0xff]   ;;  %v3658_v46 = vld [vmem:[#allocation2 + $0xa0] ss:$8 sps:$4 sm:$0xff]  }
 0x1b0   :  { %v1038_v49 = vadd.f32 %v1032_v40, %v978_v48  ;;  %v1050_v52 = vmax.f32 %v1036_v45, 0.0  ;;  %v3660_v45 = vld [vmem:[#allocation2 + $0xa4] ss:$8 sps:$4 sm:$0xff]   ;;  %v3663_v48 = vld [vmem:[#allocation2 + $0xb4] ss:$8 sps:$4 sm:$0xff]  }
 0x1b1   :  { %v1051_v51 = vmax.f32 %v1037_v47, 0.0  ;;  %v3661_v47 = vld [vmem:[#allocation2 + $0xb0] ss:$8 sps:$4 sm:$0xff]  }
 0x1b2   :  { %v1052_v53 = vmax.f32 %v1038_v49, 0.0  ;;  %v3666_v49 = vld [vmem:[#allocation2 + $0xc4] ss:$8 sps:$4 sm:$0xff]  }
 0x1b3   :  { %v1063_v54 = vpack.c.bf16 %v1051_v51, %v1049_v50  ;;  %v3664_v50 = vld [vmem:[#allocation2 + $0xc0] ss:$8 sps:$4 sm:$0xff]   ;;  %v3669_v51 = vld [vmem:[#allocation2 + $0xd4] ss:$8 sps:$4 sm:$0xff]  }
 0x1b4   :  { %v982_v55 = vpop.f32.mrb[4].mxu0  ;;  %v1064_v56 = vpack.c.bf16 %v1052_v53, %v1050_v52  ;;  %v3667_v52 = vld [vmem:[#allocation2 + $0xd0] ss:$8 sps:$4 sm:$0xff]   ;;  %v3672_v53 = vld [vmem:[#allocation2 + $0xe4] ss:$8 sps:$4 sm:$0xff]  }
 0x1b5   :  { %v1039_v57 = vadd.f32 %v1028_v39, %v982_v55  ;;  %v984_v58 = vpop.f32.mrb[5].mxu0  ;;  %v3675_v55 = vld [vmem:[#allocation2 + $0xf4] ss:$8 sps:$4 sm:$0xff]  }
 0x1b6   :  { %v1040_v59 = vadd.f32 %v1032_v40, %v984_v58  ;;  %v986_v60 = vpop.f32.mrb[6].mxu0  ;;  %1119 = vmatprep.subr.bf16.mxu1 %v1064_v56  ;;  %v3673_v56 = vld [vmem:[#allocation2 + $0xf0] ss:$8 sps:$4 sm:$0xff]  }
 0x1b7   :  { %v1041_v61 = vadd.f32 %v1028_v39, %v986_v60  ;;  %v988_v62 = vpop.f32.mrb[7].mxu0  ;;  %1120 = vmatpush1.bf16.msra.mxu1 %v1063_v54  ;;  %v1053_v1 = vmax.f32 %v1039_v57, 0.0  ;;  %v3670_v54 = vld [vmem:[#allocation2 + $0xe0] ss:$8 sps:$4 sm:$0xff]   ;;  %v3678_v57 = vld [vmem:[#allocation2 + $0x4] ss:$8 sps:$4 sm:$0xff]  }
 0x1b8   :  { %v1042_v63 = vadd.f32 %v1032_v40, %v988_v62  ;;  %v1054_v3 = vmax.f32 %v1040_v59, 0.0 }
 0x1b9   :  { %v1055_v2 = vmax.f32 %v1041_v61, 0.0 }
 0x1ba   :  { %v1056_v4 = vmax.f32 %v1042_v63, 0.0 }
 0x1bb   :  { %v1065_v5 = vpack.c.bf16 %v1055_v2, %v1053_v1 }
 0x1bc   :  { %v1066_v6 = vpack.c.bf16 %v1056_v4, %v1054_v3  ;;  %v992_v7 = vpop.f32.mrb[8].mxu0 }
 0x1bd   :  { %v1043_v8 = vadd.f32 %v1028_v39, %v992_v7  ;;  %v994_v9 = vpop.f32.mrb[9].mxu0 }
 0x1be   :  { %v1044_v10 = vadd.f32 %v1032_v40, %v994_v9  ;;  %v996_v11 = vpop.f32.mrb[10].mxu0  ;;  %1121 = vmatprep.subr.bf16.mxu1 %v1066_v6 }
 0x1bf   :  { %v1045_v21 = vadd.f32 %v1028_v39, %v996_v11  ;;  %v998_v22 = vpop.f32.mrb[11].mxu0  ;;  %1122 = vmatpush1.bf16.msra.mxu1 %v1065_v5  ;;  %v1057_v28 = vmax.f32 %v1043_v8, 0.0 }
 0x1c0   :  { %v1046_v24 = vadd.f32 %v1032_v40, %v998_v22  ;;  %v1058_v31 = vmax.f32 %v1044_v10, 0.0 }
 0x1c1   :  { %v1059_v29 = vmax.f32 %v1045_v21, 0.0 }
 0x1c2   :  { %v1060_v12 = vmax.f32 %v1046_v24, 0.0 }
 0x1c3   :  { %v1067_v13 = vpack.c.bf16 %v1059_v29, %v1057_v28 }
 0x1c4   :  { %v1068_v14 = vpack.c.bf16 %v1060_v12, %v1058_v31  ;;  %v1002_v36 = vpop.f32.mrb[28].mxu0 }
 0x1c5   :  { %v1021_v37 = vadd.f32 %v1002_v36, %v828_v26  ;;  %v1004_v41 = vpop.f32.mrb[29].mxu0  ;;  %v3649_v26 = vld [vmem:[%s4743_s5 + $0x8] sm:$0xff]  }
 0x1c6   :  { %v1022_v15 = vadd.f32 %v1004_v41, %v829_v32  ;;  %v1006_v16 = vpop.f32.mrb[30].mxu0  ;;  %1123 = vmatprep.subr.bf16.mxu1 %v1068_v14  ;;  %v3650_v32 = vld [vmem:[%s4743_s5 + $0x10] sm:$0xff]  }
 0x1c7   :  { %v1047_v17 = vadd.f32 %v1028_v39, %v1021_v37  ;;  %v1007_v18 = vpop.f32.mrb[31].mxu0  ;;  %1124 = vmatpush1.bf16.msra.mxu1 %v1067_v13  ;;  %v3651_v39 = vld [vmem:[%s4743_s5 + $0x18] sm:$0xff]  }
 0x1c8   :  { %v1048_v19 = vadd.f32 %v1032_v40, %v1022_v15  ;;  %v3654_v40 = vld [vmem:[#allocation2 + $0x84] ss:$8 sps:$4 sm:$0xff]  }
 0x1c9   :  { %v1061_v20 = vmax.f32 %v1047_v17, 0.0 }
 0x1ca   :  { %v1062_v25 = vmax.f32 %v1048_v19, 0.0  ;;  %v3676_v19 = vld [vmem:[#allocation2] ss:$8 sps:$4 sm:$0xff]  }
 0x1cb   :  { %v1069_v27 = vpack.c.bf16 %v1061_v20, %v1061_v20 }
 0x1cc   :  { %v1070_v33 = vpack.c.bf16 %v1062_v25, %v1062_v25 }
 0x1cd   :  { %v1114_v34 = vsel %vm1112_vm0, %v1069_v27, 0 }
 0x1ce   :  { %3037 = vmatprep.subr.msk.bf16.mxu1 %vm1112_vm0, %v1070_v33  ;;  %v3681_v33 = vld [vmem:[#allocation2 + $0x14] ss:$8 sps:$4 sm:$0xff]  }
 0x1cf   :  { %1126 = vmatpush1.bf16.msra.mxu1 %v1114_v34 }
 0x1d0   :  { %1327 = vmatprep.subr.bf16.mxu1 %v3654_v40 }
 0x1d2   :  { %3038 = vmatmul.mubr.msk.bf16.vlgmr.msra.gmra.mrb[0].mxu1 %vm1099_vm1, %v3648_v38 }
 0x1d3   :  { %1161 = vmatprep.mubr.bf16.mxu1 %v3931_v0  ;;  %1328 = vmatpush1.bf16.msra.mxu1 %v3652_v42  ;;  %v3684_v42 = vld [vmem:[#allocation2 + $0x24] ss:$8 sps:$4 sm:$0xff]  }
 0x1d4   :  { %1329 = vmatprep.subr.bf16.mxu1 %v3657_v44  ;;  %v3687_v44 = vld [vmem:[#allocation2 + $0x34] ss:$8 sps:$4 sm:$0xff]  }
 0x1d7   :  { %1330 = vmatpush1.bf16.msra.mxu1 %v3655_v43  ;;  %v3682_v43 = vld [vmem:[#allocation2 + $0x20] ss:$8 sps:$4 sm:$0xff]  }
 0x1d8   :  { %1331 = vmatprep.subr.bf16.mxu1 %v3660_v45  ;;  %v3685_v45 = vld [vmem:[#allocation2 + $0x30] ss:$8 sps:$4 sm:$0xff]  }
 0x1da   :  { %3039 = vmatmul.mubr.msk.bf16.gmra.mrb[4].mxu1 %vm1099_vm1, %v3649_v26 }
 0x1db   :  { %1171 = vmatprep.mubr.bf16.mxu1 %v3931_v0  ;;  %1332 = vmatpush1.bf16.msra.mxu1 %v3658_v46  ;;  %v3690_v46 = vld [vmem:[#allocation2 + $0x44] ss:$8 sps:$4 sm:$0xff]  }
 0x1dc   :  { %1333 = vmatprep.subr.bf16.mxu1 %v3663_v48  ;;  %v3693_v48 = vld [vmem:[#allocation2 + $0x54] ss:$8 sps:$4 sm:$0xff]  }
 0x1df   :  { %1334 = vmatpush1.bf16.msra.mxu1 %v3661_v47  ;;  %v3688_v47 = vld [vmem:[#allocation2 + $0x40] ss:$8 sps:$4 sm:$0xff]  }
 0x1e0   :  { %1335 = vmatprep.subr.bf16.mxu1 %v3666_v49  ;;  %v3691_v49 = vld [vmem:[#allocation2 + $0x50] ss:$8 sps:$4 sm:$0xff]  }
 0x1e2   :  { %3040 = vmatmul.mubr.msk.bf16.gmra.mrb[8].mxu1 %vm1099_vm1, %v3650_v32 }
 0x1e3   :  { %1181 = vmatprep.mubr.bf16.mxu1 %v3931_v0  ;;  %1336 = vmatpush1.bf16.msra.mxu1 %v3664_v50  ;;  %v3696_v50 = vld [vmem:[#allocation2 + $0x64] ss:$8 sps:$4 sm:$0xff]  }
 0x1e4   :  { %1337 = vmatprep.subr.bf16.mxu1 %v3669_v51  ;;  %v3694_v51 = vld [vmem:[#allocation2 + $0x60] ss:$8 sps:$4 sm:$0xff]  }
 0x1e7   :  { %1338 = vmatpush1.bf16.msra.mxu1 %v3667_v52  ;;  %v3699_v52 = vld [vmem:[#allocation2 + $0x74] ss:$8 sps:$4 sm:$0xff]  }
 0x1e8   :  { %1339 = vmatprep.subr.bf16.mxu1 %v3672_v53  ;;  %v3697_v53 = vld [vmem:[#allocation2 + $0x70] ss:$8 sps:$4 sm:$0xff]  }
 0x1ea   :  { %3041 = vmatmul.mubr.msk.bf16.gmra.mrb[12].mxu1 %vm1099_vm1, %v3651_v39  ;;  %v3679_v39 = vld [vmem:[#allocation2 + $0x10] ss:$8 sps:$4 sm:$0xff]  }
 0x1eb   :  { %1359 = vmatprep.mubr.bf16.mxu1 %v3931_v0  ;;  %1340 = vmatpush1.bf16.msra.mxu1 %v3670_v54  ;;  %v3702_v54 = vld [vmem:[#allocation2 + $0x104] ss:$8 sps:$4 sm:$0xff]  }
 0x1ec   :  { %1341 = vmatprep.subr.bf16.mxu1 %v3675_v55  ;;  %v3700_v55 = vld [vmem:[#allocation2 + $0x100] ss:$8 sps:$4 sm:$0xff]  }
 0x1ef   :  { %1342 = vmatpush1.bf16.msra.mxu1 %v3673_v56  ;;  %v3705_v56 = vld [vmem:[#allocation2 + $0x114] ss:$8 sps:$4 sm:$0xff]  }
 0x1f0   :  { %1458 = vmatprep.subr.bf16.mxu1 %v3678_v57  ;;  %v3703_v57 = vld [vmem:[#allocation2 + $0x110] ss:$8 sps:$4 sm:$0xff]  }
 0x2a5   :  { %v1153_v58 = vpop.f32.mrb[0].mxu1 }
 0x2a6   :  { %v1155_v59 = vpop.f32.mrb[1].mxu1 }
 0x2a7   :  { %v1157_v60 = vpop.f32.mrb[2].mxu1 }
 0x2a8   :  { %v1159_v61 = vpop.f32.mrb[3].mxu1 }
 0x2ad   :  { %v1163_v62 = vpop.f32.mrb[4].mxu1 }
 0x2ae   :  { %v1165_v63 = vpop.f32.mrb[5].mxu1 }
 0x2af   :  { %v1167_v1 = vpop.f32.mrb[6].mxu1 }
 0x2b0   :  { %v1169_v2 = vpop.f32.mrb[7].mxu1 }
 0x2b5   :  { %v1173_v3 = vpop.f32.mrb[8].mxu1 }
 0x2b6   :  { %v1192_v4 = vmax.f32 %v1153_v58, %v1173_v3  ;;  %v1175_v5 = vpop.f32.mrb[9].mxu1  ;;  %v3708_v58 = vld [vmem:[#allocation2 + $0x124] ss:$8 sps:$4 sm:$0xff]  }
 0x2b7   :  { %v1193_v6 = vmax.f32 %v1155_v59, %v1175_v5  ;;  %v1177_v7 = vpop.f32.mrb[10].mxu1  ;;  %v3706_v59 = vld [vmem:[#allocation2 + $0x120] ss:$8 sps:$4 sm:$0xff]   ;;  %v3720_v3 = vld [vmem:[#allocation2 + $0x164] ss:$8 sps:$4 sm:$0xff]  }
 0x2b8   :  { %v1194_v8 = vmax.f32 %v1157_v60, %v1177_v7  ;;  %v1179_v9 = vpop.f32.mrb[11].mxu1  ;;  %v3711_v60 = vld [vmem:[#allocation2 + $0x134] ss:$8 sps:$4 sm:$0xff]   ;;  %v3726_v7 = vld [vmem:[#allocation2 + $0x184] ss:$8 sps:$4 sm:$0xff]  }
 0x2b9   :  { %v1200_v10 = vmax.f32 %v1192_v4, %v1193_v6  ;;  %v1195_v11 = vmax.f32 %v1159_v61, %v1179_v9  ;;  %v3709_v61 = vld [vmem:[#allocation2 + $0x130] ss:$8 sps:$4 sm:$0xff]   ;;  %v3718_v4 = vld [vmem:[#allocation2 + $0x160] ss:$8 sps:$4 sm:$0xff]   ;;  %v3723_v5 = vld [vmem:[#allocation2 + $0x174] ss:$8 sps:$4 sm:$0xff]  }
 0x2ba   :  { %v3721_v6 = vld [vmem:[#allocation2 + $0x170] ss:$8 sps:$4 sm:$0xff]   ;;  %v3729_v9 = vld [vmem:[#allocation2 + $0x194] ss:$8 sps:$4 sm:$0xff]  }
 0x2bb   :  { %v4457_v21 = vmax.f32 %v1194_v8, %v1195_v11  ;;  %v3724_v8 = vld [vmem:[#allocation2 + $0x180] ss:$8 sps:$4 sm:$0xff]   ;;  %v3732_v11 = vld [vmem:[#allocation2 + $0x1a4] ss:$8 sps:$4 sm:$0xff]  }
 0x2bd   :  { %v4460_v22 = vpack.c.bf16 %v4457_v21, %v1200_v10  ;;  %v1183_v24 = vpop.f32.mrb[12].mxu1  ;;  %v3727_v10 = vld [vmem:[#allocation2 + $0x190] ss:$8 sps:$4 sm:$0xff]  }
 0x2be   :  { %v1196_v28 = vmax.f32 %v1163_v62, %v1183_v24  ;;  %v1185_v29 = vpop.f32.mrb[13].mxu1  ;;  %v3714_v62 = vld [vmem:[#allocation2 + $0x144] ss:$8 sps:$4 sm:$0xff]   ;;  %v3735_v24 = vld [vmem:[#allocation2 + $0x1b4] ss:$8 sps:$4 sm:$0xff]  }
 0x2bf   :  { %v1197_v31 = vmax.f32 %v1165_v63, %v1185_v29  ;;  %v1187_v12 = vpop.f32.mrb[14].mxu1  ;;  %v1242_v17 = vrot.slane %v4460_v22, 1  ;;  %v1527_v25 = vrot.slane %v4460_v22, 2  ;;  %v1689_v32 = vrot.slane %v4460_v22, 3  ;;  %v3712_v63 = vld [vmem:[#allocation2 + $0x140] ss:$8 sps:$4 sm:$0xff]  }
 0x2c0   :  { %v1198_v13 = vmax.f32 %v1167_v1, %v1187_v12  ;;  %v1189_v14 = vpop.f32.mrb[15].mxu1  ;;  %v3717_v1 = vld [vmem:[#allocation2 + $0x154] ss:$8 sps:$4 sm:$0xff]   ;;  %v3738_v29 = vld [vmem:[#allocation2 + $0x1c4] ss:$8 sps:$4 sm:$0xff]  }
 0x2c1   :  { %v4462_v36 = vmax.f32 %v1196_v28, %v1197_v31  ;;  %v1199_v37 = vmax.f32 %v1169_v2, %v1189_v14  ;;  %v3715_v2 = vld [vmem:[#allocation2 + $0x150] ss:$8 sps:$4 sm:$0xff]   ;;  %v3736_v31 = vld [vmem:[#allocation2 + $0x1c0] ss:$8 sps:$4 sm:$0xff]   ;;  %v3741_v12 = vld [vmem:[#allocation2 + $0x1d4] ss:$8 sps:$4 sm:$0xff]  }
 0x2c2   :  { %v3733_v28 = vld [vmem:[#allocation2 + $0x1b0] ss:$8 sps:$4 sm:$0xff]   ;;  %v3744_v14 = vld [vmem:[#allocation2 + $0x1e4] ss:$8 sps:$4 sm:$0xff]  }
 0x2c3   :  { %v4466_v41 = vpack.c.bf16 %v4462_v36, %v4462_v36  ;;  %v1831_v15 = vpack.c.bf16 %v4462_v36, %v4457_v21  ;;  %v4470_v16 = vmax.f32 %v1198_v13, %v1199_v37  ;;  %v3739_v13 = vld [vmem:[#allocation2 + $0x1d0] ss:$8 sps:$4 sm:$0xff]   ;;  %v3742_v37 = vld [vmem:[#allocation2 + $0x1e0] ss:$8 sps:$4 sm:$0xff]  }
 0x2c4   :  { %v3777_v21 = vld [vmem:[%s4745_s7 + $0x48] sm:$0xff]  }
 0x2c5   :  { %v1669_v18 = vpack.c.bf16 %v4470_v16, %v4462_v36  ;;  %v1243_v20 = vrot.slane %v4466_v41, 1  ;;  %v1528_v27 = vrot.slane %v4466_v41, 2  ;;  %v3779_v36 = vld [vmem:[%s4745_s7 + $0x50] sm:$0xff]  }
 0x2c7   :  { %v4478_v34 = vrot.slane %v1669_v18, 3  ;;  %v1244_v38 = vsel %vm1241_vm2, %v1242_v17, %v1243_v20  ;;  %v4482_v26 = vsel %vm1526_vm3, %v1527_v25, %v1528_v27  ;;  %v3747_v17 = vld [vmem:[#allocation2 + $0x1f4] ss:$8 sps:$4 sm:$0xff]   ;;  %v3750_v18 = vld [vmem:[#allocation2 + $0x204] ss:$8 sps:$4 sm:$0xff]  }
 0x2c8   :  { %1360 = vmatmul.mubr.bf16.vlgmr.msra.gmra.mrb[16].mxu1 %v1244_v38  ;;  %v3751_v25 = vld [vmem:[#allocation2 + $0x210] ss:$8 sps:$4 sm:$0xff]   ;;  %v3759_v38 = vld [vmem:[#allocation2 + $0x234] ss:$8 sps:$4 sm:$0xff]  }
 0x2c9   :  { %1459 = vmatpush1.bf16.msra.mxu1 %v3676_v19  ;;  %1369 = vmatprep.mubr.bf16.mxu1 %v3931_v0  ;;  %v4487_v40 = vsel %vm1688_vm4, %v1689_v32, %v4478_v34  ;;  %v3748_v19 = vld [vmem:[#allocation2 + $0x200] ss:$8 sps:$4 sm:$0xff]   ;;  %v3762_v32 = vld [vmem:[#allocation2 + $0x244] ss:$8 sps:$4 sm:$0xff]  }
 0x2ca   :  { %1460 = vmatprep.subr.bf16.mxu1 %v3681_v33  ;;  %v3754_v33 = vld [vmem:[#allocation2 + $0x220] ss:$8 sps:$4 sm:$0xff]  }
 0x2cd   :  { %1461 = vmatpush1.bf16.msra.mxu1 %v3679_v39  ;;  %v3760_v39 = vld [vmem:[#allocation2 + $0x240] ss:$8 sps:$4 sm:$0xff]  }
 0x2ce   :  { %1462 = vmatprep.subr.bf16.mxu1 %v3684_v42  ;;  %v3763_v42 = vld [vmem:[#allocation2 + $0x250] ss:$8 sps:$4 sm:$0xff]  }
 0x2d0   :  { %1370 = vmatmul.mubr.bf16.gmra.mrb[20].mxu1 %v1243_v20  ;;  %v3753_v20 = vld [vmem:[#allocation2 + $0x214] ss:$8 sps:$4 sm:$0xff]  }
 0x2d1   :  { %1463 = vmatpush1.bf16.msra.mxu1 %v3682_v43  ;;  %1490 = vmatprep.mubr.bf16.mxu1 %v3931_v0  ;;  %v3768_v43 = vld [vmem:[#allocation2 + $0x264] ss:$8 sps:$4 sm:$0xff]  }
 0x2d2   :  { %1464 = vmatprep.subr.bf16.mxu1 %v3687_v44  ;;  %v3766_v44 = vld [vmem:[#allocation2 + $0x260] ss:$8 sps:$4 sm:$0xff]  }
 0x2d5   :  { %1465 = vmatpush1.bf16.msra.mxu1 %v3685_v45  ;;  %v3771_v45 = vld [vmem:[#allocation2 + $0x274] ss:$8 sps:$4 sm:$0xff]  }
 0x2d6   :  { %1466 = vmatprep.subr.bf16.mxu1 %v3690_v46  ;;  %v1832_v46 = vpack.c.bf16 %v4470_v16, %v4470_v16  ;;  %v3781_v16 = vld [vmem:[%s4745_s7 + $0x58] sm:$0xff]  }
 0x2d9   :  { %1467 = vmatpush1.bf16.msra.mxu1 %v3688_v47 }
 0x2da   :  { %1468 = vmatprep.subr.bf16.mxu1 %v3693_v48 }
 0x2dd   :  { %1469 = vmatpush1.bf16.msra.mxu1 %v3691_v49 }
 0x2de   :  { %1470 = vmatprep.subr.bf16.mxu1 %v3696_v50 }
 0x2e1   :  { %1471 = vmatpush1.bf16.msra.mxu1 %v3694_v51  ;;  %v3775_v51 = vld [vmem:[%s4745_s7 + $0x40] sm:$0xff]  }
 0x2e2   :  { %1472 = vmatprep.subr.bf16.mxu1 %v3699_v52  ;;  %v3932_v52 = vmov 0.0  }
 0x2e5   :  { %1473 = vmatpush1.bf16.msra.mxu1 %v3697_v53 }
 0x2e6   :  { %1612 = vmatprep.subr.bf16.mxu1 %v3702_v54 }
 0x2e8   :  { %1491 = vmatmul.mubr.bf16.vlgmr.msra.gmra.mrb[16].mxu1 %v4460_v22  ;;  %v3730_v22 = vld [vmem:[#allocation2 + $0x1a0] ss:$8 sps:$4 sm:$0xff]  }
 0x2e9   :  { %1613 = vmatpush1.bf16.msra.mxu1 %v3700_v55  ;;  %1500 = vmatprep.mubr.bf16.mxu1 %v3931_v0 }
 0x2ea   :  { %1614 = vmatprep.subr.bf16.mxu1 %v3705_v56 }
 0x2ed   :  { %1615 = vmatpush1.bf16.msra.mxu1 %v3703_v57 }
 0x2ee   :  { %1616 = vmatprep.subr.bf16.mxu1 %v3708_v58  ;;  %v3783_v58 = vld [vmem:[%s4745_s7 + $0x60] sm:$0xff]  }
 0x2f0   :  { %1501 = vmatmul.mubr.bf16.gmra.mrb[24].mxu1 %v4466_v41  ;;  %v3745_v41 = vld [vmem:[#allocation2 + $0x1f0] ss:$8 sps:$4 sm:$0xff]  }
 0x2f1   :  { %1617 = vmatpush1.bf16.msra.mxu1 %v3706_v59  ;;  %1644 = vmatprep.mubr.bf16.mxu1 %v3931_v0 }
 0x2f2   :  { %1618 = vmatprep.subr.bf16.mxu1 %v3711_v60 }
 0x2f5   :  { %1619 = vmatpush1.bf16.msra.mxu1 %v3709_v61 }
 0x2f6   :  { %1620 = vmatprep.subr.bf16.mxu1 %v3714_v62 }
 0x2f9   :  { %1621 = vmatpush1.bf16.msra.mxu1 %v3712_v63 }
 0x2fa   :  { %1622 = vmatprep.subr.bf16.mxu1 %v3717_v1 }
 0x2fd   :  { %1623 = vmatpush1.bf16.msra.mxu1 %v3715_v2 }
 0x2fe   :  { %1624 = vmatprep.subr.bf16.mxu1 %v3720_v3 }
 0x301   :  { %1625 = vmatpush1.bf16.msra.mxu1 %v3718_v4 }
 0x302   :  { %1626 = vmatprep.subr.bf16.mxu1 %v3723_v5 }
 0x305   :  { %1627 = vmatpush1.bf16.msra.mxu1 %v3721_v6 }
 0x306   :  { %1774 = vmatprep.subr.bf16.mxu1 %v3726_v7 }
 0x308   :  { %1645 = vmatmul.mubr.bf16.vlgmr.msra.gmra.mrb[16].mxu1 %v4482_v26  ;;  %v3757_v26 = vld [vmem:[#allocation2 + $0x230] ss:$8 sps:$4 sm:$0xff]  }
 0x309   :  { %1775 = vmatpush1.bf16.msra.mxu1 %v3724_v8  ;;  %1654 = vmatprep.mubr.bf16.mxu1 %v3931_v0  ;;  %v1987_v8 = vld [vmem:[%s4742_s4] sm:$0x3]  ;;  %s3934_s4 = smov [#allocation8]  }
 0x30a   :  { %1776 = vmatprep.subr.bf16.mxu1 %v3729_v9  ;;  %v1992_v9 = vrot.slane %v1987_v8, %v1027_v30  ;;  %s2879_s1 = sshll.u32 %s3934_s4, 4  ;;  %s2880_s1 = int_to_ptr.vmem [resolvable:$true] %s2879_s1 }
 0x30b   :  { %p3901_p11 = scmp.lt.s32.totalorder %s2880_s1, %s2880_s1 }
 0x30d   :  { %1777 = vmatpush1.bf16.msra.mxu1 %v3727_v10  ;;  %v1996_v10 = vrot.slane %v1987_v8, %v1031_v35  ;;  %v3794_v8 = vld [vmem:[%s4745_s7 + $0xd0] sm:$0xff]  }
 0x30e   :  { %1778 = vmatprep.subr.bf16.mxu1 %v3732_v11 }
 0x310   :  { %1655 = vmatmul.mubr.bf16.gmra.mrb[28].mxu1 %v1528_v27  ;;  %v3756_v27 = vld [vmem:[#allocation2 + $0x224] ss:$8 sps:$4 sm:$0xff]  }
 0x311   :  { %1779 = vmatpush1.bf16.msra.mxu1 %v3730_v22  ;;  %1806 = vmatprep.mubr.bf16.mxu1 %v3931_v0 }
 0x312   :  { %1780 = vmatprep.subr.bf16.mxu1 %v3735_v24 }
 0x315   :  { %1781 = vmatpush1.bf16.msra.mxu1 %v3733_v28 }
 0x316   :  { %1782 = vmatprep.subr.bf16.mxu1 %v3738_v29 }
 0x319   :  { %1783 = vmatpush1.bf16.msra.mxu1 %v3736_v31 }
 0x31a   :  { %1784 = vmatprep.subr.bf16.mxu1 %v3741_v12 }
 0x31d   :  { %1785 = vmatpush1.bf16.msra.mxu1 %v3739_v13 }
 0x31e   :  { %1786 = vmatprep.subr.bf16.mxu1 %v3744_v14 }
 0x321   :  { %1787 = vmatpush1.bf16.msra.mxu1 %v3742_v37 }
 0x322   :  { %1788 = vmatprep.subr.bf16.mxu1 %v3747_v17 }
 0x325   :  { %1789 = vmatpush1.bf16.msra.mxu1 %v3745_v41 }
 0x326   :  { %1930 = vmatprep.subr.bf16.mxu1 %v3750_v18 }
 0x328   :  { %1807 = vmatmul.mubr.bf16.vlgmr.msra.gmra.mrb[16].mxu1 %v4487_v40  ;;  %v3765_v40 = vld [vmem:[#allocation2 + $0x254] ss:$8 sps:$4 sm:$0xff]  }
 0x329   :  { %1931 = vmatpush1.bf16.msra.mxu1 %v3748_v19  ;;  %1816 = vmatprep.mubr.bf16.mxu1 %v3931_v0 }
 0x32a   :  { %1932 = vmatprep.subr.bf16.mxu1 %v3753_v20 }
 0x32d   :  { %1933 = vmatpush1.bf16.msra.mxu1 %v3751_v25 }
 0x32e   :  { %1934 = vmatprep.subr.bf16.mxu1 %v3756_v27 }
 0x330   :  { %1817 = vmatmul.mubr.bf16.gmra.mrb[32].mxu1 %v4478_v34  ;;  %v3769_v34 = vld [vmem:[#allocation2 + $0x270] ss:$8 sps:$4 sm:$0xff]  }
 0x331   :  { %1935 = vmatpush1.bf16.msra.mxu1 %v3754_v33  ;;  %1962 = vmatprep.mubr.bf16.mxu1 %v3931_v0 }
 0x332   :  { %1936 = vmatprep.subr.bf16.mxu1 %v3759_v38 }
 0x335   :  { %1937 = vmatpush1.bf16.msra.mxu1 %v3757_v26 }
 0x336   :  { %1938 = vmatprep.subr.bf16.mxu1 %v3762_v32 }
 0x339   :  { %1939 = vmatpush1.bf16.msra.mxu1 %v3760_v39 }
 0x33a   :  { %1940 = vmatprep.subr.bf16.mxu1 %v3765_v40 }
 0x33d   :  { %1941 = vmatpush1.bf16.msra.mxu1 %v3763_v42 }
 0x33e   :  { %1942 = vmatprep.subr.bf16.mxu1 %v3768_v43  ;;  %v3772_v43 = vld [vmem:[%s4744_s6] sm:$0xff]  }
 0x341   :  { %1943 = vmatpush1.bf16.msra.mxu1 %v3766_v44  ;;  %v3774_v44 = vld [vmem:[%s4745_s7] sm:$0xff]  }
 0x342   :  { %1944 = vmatprep.subr.bf16.mxu1 %v3771_v45  ;;  %v3776_v45 = vld [vmem:[%s4745_s7 + $0x8] sm:$0xff]  }
 0x345   :  { %1945 = vmatpush1.bf16.msra.mxu1 %v3769_v34  ;;  %v3773_v34 = vld [vmem:[%s4744_s6 + $0x8] sm:$0xff]  }
 0x346   :  { %3313 = vmatprep.subr.bf16.mxu1 %v3932_v52 }
 0x348   :  { %1963 = vmatmul.mubr.bf16.vlgmr.msra.gmra.mrb[16].mxu1 %v1831_v15 }
 0x349   :  { %1972 = vmatprep.mubr.bf16.mxu1 %v3931_v0  ;;  %3314 = vmatpush3.bf16.msra.mxu1 %v3775_v51  ;;  %v3787_v51 = vld [vmem:[%s4745_s7 + $0x70] sm:$0xff]  }
 0x34a   :  { %3315 = vmatprep.subr.bf16.mxu1 %v3932_v52 }
 0x34d   :  { %3316 = vmatpush3.bf16.msra.mxu1 %v3777_v21  ;;  %v3788_v21 = vld [vmem:[%s4745_s7 + $0x38] sm:$0xff]  }
 0x34e   :  { %3317 = vmatprep.subr.bf16.mxu1 %v3932_v52 }
 0x350   :  { %1973 = vmatmul.mubr.bf16.gmra.mrb[36].mxu1 %v1832_v46  ;;  %v3778_v46 = vld [vmem:[%s4745_s7 + $0x10] sm:$0xff]  }
 0x351   :  { %3318 = vmatpush3.bf16.msra.mxu1 %v3779_v36  ;;  %v3789_v36 = vld [vmem:[%s4745_s7 + $0x78] sm:$0xff]   ;;  %3329 = vmatprep.mubr.msk.bf16.mxu1 %vm3933_vm7, %v3932_v52 }
 0x352   :  { %3319 = vmatprep.subr.bf16.mxu1 %v3932_v52 }
 0x355   :  { %3320 = vmatpush3.bf16.msra.mxu1 %v3781_v16 }
 0x356   :  { %3321 = vmatprep.subr.bf16.mxu1 %v3932_v52 }
 0x359   :  { %3322 = vmatpush3.bf16.msra.mxu1 %v3783_v58 }
 0x35a   :  { %3323 = vmatprep.subr.bf16.mxu1 %v3932_v52 }
 0x3a3   :  { %v1371_v47 = vpop.f32.mrb[20].mxu1 }
 0x3a4   :  { %v1373_v48 = vpop.f32.mrb[21].mxu1 }
 0x3a5   :  { %v1375_v49 = vpop.f32.mrb[22].mxu1 }
 0x3a6   :  { %v1376_v50 = vpop.f32.mrb[23].mxu1  ;;  %v3785_v49 = vld [vmem:[%s4745_s7 + $0x68] sm:$0xff]  }
 0x3a7   :  { %3324 = vmatpush3.bf16.msra.mxu1 %v3785_v49  ;;  %v3786_v50 = vld [vmem:[%s4745_s7 + $0x30] sm:$0xff]  }
 0x3a8   :  { %3325 = vmatprep.subr.bf16.mxu1 %v3932_v52 }
 0x3ab   :  { %3326 = vmatpush3.bf16.msra.mxu1 %v3787_v51 }
 0x3ac   :  { %3327 = vmatprep.subr.bf16.mxu1 %v3932_v52 }
 0x3af   :  { %3328 = vmatpush3.bf16.msra.mxu1 %v3789_v36 }
 0x3b0   :  { %3353 = vmatprep.subr.bf16.mxu1 %v3932_v52 }
 0x3c3   :  { %v1502_v15 = vpop.f32.mrb[24].mxu1 }
 0x3c4   :  { %v1503_v53 = vadd.f32 %v1502_v15, %v1371_v47  ;;  %v1504_v54 = vpop.f32.mrb[25].mxu1  ;;  %v3782_v47 = vld [vmem:[%s4745_s7 + $0x20] sm:$0xff]  }
 0x3c5   :  { %v1505_v55 = vadd.f32 %v1504_v54, %v1373_v48  ;;  %v1506_v56 = vpop.f32.mrb[26].mxu1  ;;  %v3784_v48 = vld [vmem:[%s4745_s7 + $0x28] sm:$0xff]  }
 0x3c6   :  { %v1507_v57 = vpop.f32.mrb[27].mxu1 }
 0x3e3   :  { %v1656_v59 = vpop.f32.mrb[28].mxu1 }
 0x3e4   :  { %v1667_v60 = vadd.f32 %v1656_v59, %v1503_v53  ;;  %v1658_v61 = vpop.f32.mrb[29].mxu1 }
 0x3e5   :  { %v1668_v62 = vadd.f32 %v1658_v61, %v1505_v55  ;;  %v1660_v63 = vpop.f32.mrb[30].mxu1 }
 0x3e6   :  { %v1661_v1 = vpop.f32.mrb[31].mxu1 }
 0x3e7   :  { %v3790_v1 = vld [vmem:[%s4745_s7 + $0xc0] sm:$0xff]  }
 0x403   :  { %v1818_v2 = vpop.f32.mrb[32].mxu1 }
 0x404   :  { %v1829_v3 = vadd.f32 %v1818_v2, %v1667_v60  ;;  %v1820_v4 = vpop.f32.mrb[33].mxu1 }
 0x405   :  { %v1830_v5 = vadd.f32 %v1820_v4, %v1668_v62  ;;  %v1822_v6 = vpop.f32.mrb[34].mxu1  ;;  %v3791_v4 = vld [vmem:[%s4745_s7 + $0x80] sm:$0xff]  }
 0x406   :  { %v1823_v7 = vpop.f32.mrb[35].mxu1  ;;  %v3792_v6 = vld [vmem:[%s4745_s7 + $0xc8] sm:$0xff]  }
 0x407   :  { %v3793_v7 = vld [vmem:[%s4745_s7 + $0x88] sm:$0xff]  }
 0x41b   :  { %v1964_v11 = vpop.f32.mrb[16].mxu1 }
 0x41c   :  { %v1999_v22 = vadd.f32 %v1992_v9, %v1964_v11  ;;  %v1966_v24 = vpop.f32.mrb[17].mxu1  ;;  %v3797_v11 = vld [vmem:[%s4745_s7 + $0x98] sm:$0xff]  }
 0x41d   :  { %v2000_v28 = vadd.f32 %v1996_v10, %v1966_v24  ;;  %v1968_v29 = vpop.f32.mrb[18].mxu1  ;;  %v3799_v24 = vld [vmem:[%s4745_s7 + $0xa0] sm:$0xff]  }
 0x41e   :  { %v2001_v31 = vadd.f32 %v1992_v9, %v1968_v29  ;;  %v1970_v12 = vpop.f32.mrb[19].mxu1  ;;  %v2005_v14 = vmax.f32 %v1999_v22, 0.0  ;;  %v3798_v22 = vld [vmem:[%s4745_s7 + $0xe0] sm:$0xff]   ;;  %v3801_v29 = vld [vmem:[%s4745_s7 + $0xa8] sm:$0xff]  }
 0x41f   :  { %v2002_v13 = vadd.f32 %v1996_v10, %v1970_v12  ;;  %v2006_v17 = vmax.f32 %v2000_v28, 0.0  ;;  %v3800_v28 = vld [vmem:[%s4745_s7 + $0xe8] sm:$0xff]   ;;  %v3803_v12 = vld [vmem:[%s4745_s7 + $0xb0] sm:$0xff]  }
 0x420   :  { %v2007_v37 = vmax.f32 %v2001_v31, 0.0  ;;  %v3802_v31 = vld [vmem:[%s4745_s7 + $0xf0] sm:$0xff]  }
 0x421   :  { %v2008_v41 = vmax.f32 %v2002_v13, 0.0  ;;  %v3804_v13 = vld [vmem:[%s4745_s7 + $0xf8] sm:$0xff]  }
 0x422   :  { %v2011_v18 = vpack.c.bf16 %v2007_v37, %v2005_v14  ;;  %v3805_v14 = vld [vmem:[%s4745_s7 + $0xb8] sm:$0xff]  }
 0x423   :  { %v2012_v19 = vpack.c.bf16 %v2008_v41, %v2006_v17  ;;  %v1974_v20 = vpop.f32.mrb[36].mxu1  ;;  %v3806_v17 = vld [vmem:[%s4745_s7 + $0x100] sm:$0xff]  }
 0x424   :  { %v1985_v25 = vadd.f32 %v1974_v20, %v1829_v3  ;;  %v1976_v30 = vpop.f32.mrb[37].mxu1  ;;  %v3809_v20 = vld [vmem:[%s4745_s7 + $0x118] sm:$0xff]  }
 0x425   :  { %v1986_v27 = vadd.f32 %v1976_v30, %v1830_v5  ;;  %v1978_v23 = vpop.f32.mrb[38].mxu1  ;;  %2043 = vmatprep.subr.bf16.mxu0 %v2012_v19  ;;  %v3808_v19 = vld [vmem:[%s4745_s7 + $0x110] sm:$0xff]   ;;  %v3811_v30 = vld [vmem:[%s4745_s7 + $0x128] sm:$0xff]  }
 0x426   :  { %v2003_v35 = vadd.f32 %v1992_v9, %v1985_v25  ;;  %v1979_v33 = vpop.f32.mrb[39].mxu1  ;;  %2044 = vmatpush1.bf16.msra.mxu0 %v2011_v18  ;;  %v3795_v9 = vld [vmem:[%s4745_s7 + $0x90] sm:$0xff]   ;;  %v3807_v18 = vld [vmem:[%s4745_s7 + $0x108] sm:$0xff]   ;;  %v3810_v25 = vld [vmem:[%s4745_s7 + $0x120] sm:$0xff]  }
 0x427   :  { %v2004_v38 = vadd.f32 %v1996_v10, %v1986_v27  ;;  %v3796_v10 = vld [vmem:[%s4745_s7 + $0xd8] sm:$0xff]   ;;  %v3812_v27 = vld [vmem:[%s4745_s7 + $0x130] sm:$0xff]   ;;  %v3814_v33 = vld [vmem:[#allocation5] sm:$0xff]  }
 0x428   :  { %v2009_v26 = vmax.f32 %v2003_v35, 0.0  ;;  %v3813_v23 = vld [vmem:[%s4745_s7 + $0x138] sm:$0xff]  }
 0x429   :  { %v2010_v32 = vmax.f32 %v2004_v38, 0.0  ;;  %v3815_v38 = vld [vmem:[#allocation5 + $0x8] sm:$0xff]  }
 0x42a   :  { %v2013_v39 = vpack.c.bf16 %v2009_v26, %v2009_v26  ;;  %v3816_v26 = vld [vmem:[#allocation5 + $0x10] sm:$0xff]  }
 0x42b   :  { %v2014_v40 = vpack.c.bf16 %v2010_v32, %v2010_v32  ;;  %v3817_v32 = vld [vmem:[#allocation5 + $0x18] sm:$0xff]  }
 0x42c   :  { %v2038_v42 = vsel %vm2036_vm5, %v2013_v39, 0  ;;  %v3818_v39 = vld [vmem:[#allocation5 + $0x20] sm:$0xff]  }
 0x42d   :  { %3124 = vmatprep.subr.msk.bf16.mxu0 %vm2036_vm5, %v2014_v40  ;;  %v3819_v40 = vld [vmem:[#allocation5 + $0x28] sm:$0xff]  }
 0x42e   :  { %2046 = vmatpush1.bf16.msra.mxu0 %v2038_v42  ;;  %v3820_v42 = vld [vmem:[#allocation5 + $0x30] sm:$0xff]  }
 0x42f   :  { %3333 = vmatprep.subr.bf16.mxu0 %v3932_v52 }
 0x431   :  { %3125 = vmatmul.mubr.msk.bf16.vlgmr.msra.gmra.mrb[32].mxu0 %vm2029_vm6, %v3772_v43  ;;  %v3821_v43 = vld [vmem:[#allocation5 + $0x38] sm:$0xff]  }
 0x432   :  { %2085 = vmatprep.mubr.bf16.mxu0 %v3931_v0  ;;  %3334 = vmatpush3.bf16.msra.mxu0 %v3774_v44  ;;  %v3780_v0 = vld [vmem:[%s4745_s7 + $0x18] sm:$0xff]   ;;  %v3822_v44 = vld [vmem:[#allocation7] sm:$0xff]  }
 0x433   :  { %3335 = vmatprep.subr.bf16.mxu0 %v3932_v52 }
 0x436   :  { %3336 = vmatpush3.bf16.msra.mxu0 %v3776_v45  ;;  %v3823_v45 = vld [vmem:[#allocation7 + $0x8] sm:$0xff]  }
 0x437   :  { %3337 = vmatprep.subr.bf16.mxu0 %v3932_v52 }
 0x439   :  { %3126 = vmatmul.mubr.msk.bf16.gmra.mrb[36].mxu0 %vm2029_vm6, %v3773_v34  ;;  %v3824_v34 = vld [vmem:[#allocation7 + $0x10] sm:$0xff]  }
 0x43a   :  { %3338 = vmatpush3.bf16.msra.mxu0 %v3778_v46  ;;  %3349 = vmatprep.mubr.msk.bf16.mxu0 %vm3933_vm7, %v3932_v52  ;;  %v3825_v46 = vld [vmem:[#allocation7 + $0x18] sm:$0xff]  }
 0x43b   :  { %3339 = vmatprep.subr.bf16.mxu0 %v3932_v52 }
 0x43e   :  { %3340 = vmatpush3.bf16.msra.mxu0 %v3780_v0  ;;  %v3826_v0 = vld [vmem:[#allocation7 + $0x20] sm:$0xff]  }
 0x43f   :  { %3341 = vmatprep.subr.bf16.mxu0 %v3932_v52 }
 0x442   :  { %3342 = vmatpush3.bf16.msra.mxu0 %v3782_v47  ;;  %v3827_v47 = vld [vmem:[#allocation7 + $0x28] sm:$0xff]  }
 0x443   :  { %3343 = vmatprep.subr.bf16.mxu0 %v3932_v52 }
 0x446   :  { %3344 = vmatpush3.bf16.msra.mxu0 %v3784_v48 }
 0x447   :  { %3345 = vmatprep.subr.bf16.mxu0 %v3932_v52 }
 0x44a   :  { %3346 = vmatpush3.bf16.msra.mxu0 %v3786_v50 }
 0x44b   :  { %3347 = vmatprep.subr.bf16.mxu0 %v3932_v52 }
 0x44e   :  { %3348 = vmatpush3.bf16.msra.mxu0 %v3788_v21 }
 0x44f   :  { %3373 = vmatprep.subr.bf16.mxu0 %v3932_v52 }
 0x504   :  { %v2077_v15 = vpop.f32.mrb[32].mxu0 }
 0x505   :  { %v2079_v16 = vpop.f32.mrb[33].mxu0 }
 0x506   :  { %v2081_v53 = vpop.f32.mrb[34].mxu0 }
 0x507   :  { %v2083_v54 = vpop.f32.mrb[35].mxu0 }
 0x50c   :  { %v2087_v55 = vpop.f32.mrb[36].mxu0 }
 0x50d   :  { %v2096_v56 = vmax.f32 %v2077_v15, %v2087_v55  ;;  %v2089_v57 = vpop.f32.mrb[37].mxu0 }
 0x50e   :  { %v2097_v58 = vmax.f32 %v2079_v16, %v2089_v57  ;;  %v2091_v59 = vpop.f32.mrb[38].mxu0 }
 0x50f   :  { %v2098_v60 = vmax.f32 %v2081_v53, %v2091_v59  ;;  %v2093_v61 = vpop.f32.mrb[39].mxu0 }
 0x510   :  { %v2100_v62 = vmax.f32 %v2096_v56, %v2097_v58  ;;  %v2099_v63 = vmax.f32 %v2083_v54, %v2093_v61 }
 0x512   :  { %v2102_v2 = vpack.c.bf16 %v2100_v62, %v2100_v62  ;;  %v4596_v3 = vmax.f32 %v2098_v60, %v2099_v63 }
 0x514   :  { %v2137_v5 = vrot.slane %v2102_v2, 1  ;;  %3350 = vmatmul.mubr.bf16.vlgmr.msra.gmra.mrb[40].mxu0 %v2102_v2  ;;  %v2440_v37 = vrot.slane %v2102_v2, 3  ;;  %v2332_v41 = vrot.slane %v2102_v2, 2  ;;  %v2531_v35 = vpack.c.bf16 %v4596_v3, %v4596_v3  ;;  %v3231_v2 = vld [vmem:[%s4746_s8] ss:$0 sm:$0xff] }
 0x515   :  { %3374 = vmatpush3.bf16.msra.mxu0 %v3790_v1  ;;  %3389 = vmatprep.mubr.msk.bf16.mxu0 %vm3933_vm7, %v3932_v52 }
 0x516   :  { %3330 = vmatmul.mubr.bf16.vlgmr.msra.gmra.mrb[40].mxu1 %v2137_v5  ;;  %3375 = vmatprep.subr.bf16.mxu0 %v3932_v52 }
 0x517   :  { %3354 = vmatpush3.bf16.msra.mxu1 %v3791_v4  ;;  %3369 = vmatprep.mubr.msk.bf16.mxu1 %vm3933_vm7, %v3932_v52 }
 0x518   :  { %3355 = vmatprep.subr.bf16.mxu1 %v3932_v52 }
 0x519   :  { %3376 = vmatpush3.bf16.msra.mxu0 %v3792_v6 }
 0x51a   :  { %3377 = vmatprep.subr.bf16.mxu0 %v3932_v52 }
 0x51b   :  { %3356 = vmatpush3.bf16.msra.mxu1 %v3793_v7 }
 0x51c   :  { %3357 = vmatprep.subr.bf16.mxu1 %v3932_v52 }
 0x51d   :  { %3378 = vmatpush3.bf16.msra.mxu0 %v3794_v8 }
 0x51e   :  { %3379 = vmatprep.subr.bf16.mxu0 %v3932_v52 }
 0x51f   :  { %3358 = vmatpush3.bf16.msra.mxu1 %v3795_v9 }
 0x520   :  { %3359 = vmatprep.subr.bf16.mxu1 %v3932_v52 }
 0x521   :  { %3380 = vmatpush3.bf16.msra.mxu0 %v3796_v10  ;;  %v3828_v10 = vld [vmem:[#allocation7 + $0x30] sm:$0xff]  }
 0x522   :  { %3381 = vmatprep.subr.bf16.mxu0 %v3932_v52 }
 0x523   :  { %3360 = vmatpush3.bf16.msra.mxu1 %v3797_v11  ;;  %v3829_v11 = vld [vmem:[#allocation7 + $0x38] sm:$0xff]  }
 0x524   :  { %3361 = vmatprep.subr.bf16.mxu1 %v3932_v52 }
 0x525   :  { %3382 = vmatpush3.bf16.msra.mxu0 %v3798_v22  ;;  %v3232_v22 = vld [vmem:[%s4748_s10] ss:$0 sm:$0xff]  ;;  %s3896_s10 = scalar_lea.vmem %s2880_s1, 32 }
 0x526   :  { %3383 = vmatprep.subr.bf16.mxu0 %v3932_v52  ;;  %p3897_p10 = scmp.ne.s32.totalorder %s2880_s1, %s3896_s10  ;;  %p3902_p12 = scmp.lt.s32.totalorder %s3896_s10, %s3896_s10 }
 0x527   :  { %3362 = vmatpush3.bf16.msra.mxu1 %v3799_v24 }
 0x528   :  { %3363 = vmatprep.subr.bf16.mxu1 %v3932_v52  ;;  %p3903_p13 = por %p3902_p12, %p3901_p11 }
 0x529   :  { %3384 = vmatpush3.bf16.msra.mxu0 %v3800_v28 }
 0x52a   :  { %3385 = vmatprep.subr.bf16.mxu0 %v3932_v52  ;;  %p3904_p0 = pnand %p3903_p13, %p3897_p10 }
 0x52b   :  { %3364 = vmatpush3.bf16.msra.mxu1 %v3801_v29 }
 0x52c   :  { %3365 = vmatprep.subr.bf16.mxu1 %v3932_v52 }
 0x52d   :  { %3386 = vmatpush3.bf16.msra.mxu0 %v3802_v31 }
 0x52e   :  { %3387 = vmatprep.subr.bf16.mxu0 %v3932_v52 }
 0x52f   :  { %3366 = vmatpush3.bf16.msra.mxu1 %v3803_v12 }
 0x530   :  { %3367 = vmatprep.subr.bf16.mxu1 %v3932_v52 }
 0x531   :  { %3388 = vmatpush3.bf16.msra.mxu0 %v3804_v13 }
 0x532   :  { %3413 = vmatprep.subr.bf16.mxu0 %v3932_v52 }
 0x533   :  { %3368 = vmatpush3.bf16.msra.mxu1 %v3805_v14 }
 0x534   :  { %3390 = vmatmul.mubr.bf16.vlgmr.msra.gmra.mrb[44].mxu0 %v2440_v37  ;;  %3393 = vmatprep.subr.bf16.mxu1 %v3932_v52  ;;  %v3241_v37 = vld [vmem:[%s4750_s12] ss:$0 sm:$0xff] }
 0x535   :  { %3429 = vmatprep.mubr.msk.bf16.mxu0 %vm3933_vm7, %v3932_v52  ;;  %3414 = vmatpush3.bf16.msra.mxu0 %v3814_v33 }
 0x536   :  { %3370 = vmatmul.mubr.bf16.vlgmr.msra.gmra.mrb[44].mxu1 %v2332_v41  ;;  %3415 = vmatprep.subr.bf16.mxu0 %v3932_v52 }
 0x537   :  { %3394 = vmatpush3.bf16.msra.mxu1 %v3806_v17  ;;  %3409 = vmatprep.mubr.msk.bf16.mxu1 %vm3933_vm7, %v3932_v52 }
 0x538   :  { %3395 = vmatprep.subr.bf16.mxu1 %v3932_v52 }
 0x539   :  { %3416 = vmatpush3.bf16.msra.mxu0 %v3815_v38 }
 0x53a   :  { %3417 = vmatprep.subr.bf16.mxu0 %v3932_v52 }
 0x53b   :  { %3396 = vmatpush3.bf16.msra.mxu1 %v3807_v18 }
 0x53c   :  { %3397 = vmatprep.subr.bf16.mxu1 %v3932_v52 }
 0x53d   :  { %3418 = vmatpush3.bf16.msra.mxu0 %v3816_v26 }
 0x53e   :  { %3419 = vmatprep.subr.bf16.mxu0 %v3932_v52 }
 0x53f   :  { %3398 = vmatpush3.bf16.msra.mxu1 %v3808_v19 }
 0x540   :  { %3399 = vmatprep.subr.bf16.mxu1 %v3932_v52 }
 0x541   :  { %3420 = vmatpush3.bf16.msra.mxu0 %v3817_v32 }
 0x542   :  { %3421 = vmatprep.subr.bf16.mxu0 %v3932_v52 }
 0x543   :  { %3400 = vmatpush3.bf16.msra.mxu1 %v3809_v20 }
 0x544   :  { %3401 = vmatprep.subr.bf16.mxu1 %v3932_v52 }
 0x545   :  { %3422 = vmatpush3.bf16.msra.mxu0 %v3818_v39 }
 0x546   :  { %3423 = vmatprep.subr.bf16.mxu0 %v3932_v52 }
 0x547   :  { %3402 = vmatpush3.bf16.msra.mxu1 %v3810_v25 }
 0x548   :  { %3403 = vmatprep.subr.bf16.mxu1 %v3932_v52 }
 0x549   :  { %3424 = vmatpush3.bf16.msra.mxu0 %v3819_v40 }
 0x54a   :  { %3425 = vmatprep.subr.bf16.mxu0 %v3932_v52 }
 0x54b   :  { %3404 = vmatpush3.bf16.msra.mxu1 %v3811_v30 }
 0x54c   :  { %3405 = vmatprep.subr.bf16.mxu1 %v3932_v52 }
 0x54d   :  { %3426 = vmatpush3.bf16.msra.mxu0 %v3820_v42 }
 0x54e   :  { %3427 = vmatprep.subr.bf16.mxu0 %v3932_v52 }
 0x54f   :  { %3406 = vmatpush3.bf16.msra.mxu1 %v3812_v27 }
 0x550   :  { %3407 = vmatprep.subr.bf16.mxu1 %v3932_v52 }
 0x551   :  { %3428 = vmatpush3.bf16.msra.mxu0 %v3821_v43 }
 0x553   :  { %3408 = vmatpush3.bf16.msra.mxu1 %v3813_v23 }
 0x554   :  { %3433 = vmatprep.subr.bf16.mxu1 %v3932_v52 }
 0x556   :  { %3410 = vmatmul.mubr.bf16.vlgmr.msra.gmra.mrb[48].mxu1 %v2531_v35 }
 0x557   :  { %3449 = vmatprep.mubr.msk.bf16.mxu1 %vm3933_vm7, %v3932_v52  ;;  %3434 = vmatpush3.bf16.msra.mxu1 %v3822_v44 }
 0x558   :  { %3435 = vmatprep.subr.bf16.mxu1 %v3932_v52 }
 0x55b   :  { %3436 = vmatpush3.bf16.msra.mxu1 %v3823_v45 }
 0x55c   :  { %3437 = vmatprep.subr.bf16.mxu1 %v3932_v52 }
 0x55f   :  { %3438 = vmatpush3.bf16.msra.mxu1 %v3824_v34 }
 0x560   :  { %3439 = vmatprep.subr.bf16.mxu1 %v3932_v52 }
 0x563   :  { %3440 = vmatpush3.bf16.msra.mxu1 %v3825_v46 }
 0x564   :  { %3441 = vmatprep.subr.bf16.mxu1 %v3932_v52 }
 0x567   :  { %3442 = vmatpush3.bf16.msra.mxu1 %v3826_v0 }
 0x568   :  { %3443 = vmatprep.subr.bf16.mxu1 %v3932_v52 }
 0x56b   :  { %3444 = vmatpush3.bf16.msra.mxu1 %v3827_v47 }
 0x56c   :  { %3445 = vmatprep.subr.bf16.mxu1 %v3932_v52 }
 0x56f   :  { %3446 = vmatpush3.bf16.msra.mxu1 %v3828_v10 }
 0x570   :  { %3447 = vmatprep.subr.bf16.mxu1 %v3932_v52 }
 0x573   :  { %3448 = vmatpush3.bf16.msra.mxu1 %v3829_v11 }
 0x5e7   :  { %v2309_v48 = vpop.f32.mrb[40].mxu0 }
 0x5e8   :  { %v3351_v49 = vpop.f32.mrb[41].mxu0 }
 0x5e9   :  { %v2221_v50 = vpop.f32.mrb[40].mxu1  ;;  %v2312_v51 = vpop.f32.mrb[42].mxu0 }
 0x5ea   :  { %v2310_v21 = vadd.f32 %v2309_v48, %v2221_v50  ;;  %v3331_v36 = vpop.f32.mrb[41].mxu1  ;;  %v3352_v15 = vpop.f32.mrb[43].mxu0 }
 0x5eb   :  { %v2224_v16 = vpop.f32.mrb[42].mxu1 }
 0x5ec   :  { %v3332_v53 = vpop.f32.mrb[43].mxu1 }
 0x607   :  { %v2524_v54 = vpop.f32.mrb[44].mxu0 }
 0x608   :  { %v3391_v55 = vpop.f32.mrb[45].mxu0 }
 0x609   :  { %v2416_v56 = vpop.f32.mrb[44].mxu1  ;;  %v2527_v57 = vpop.f32.mrb[46].mxu0 }
 0x60a   :  { %v2422_v58 = vadd.f32 %v2416_v56, %v2310_v21  ;;  %v3371_v59 = vpop.f32.mrb[45].mxu1  ;;  %v3392_v60 = vpop.f32.mrb[47].mxu0 }
 0x60b   :  { %v2419_v61 = vpop.f32.mrb[46].mxu1 }
 0x60c   :  { %v3372_v62 = vpop.f32.mrb[47].mxu1  ;;  %v2530_v63 = vadd.f32 %v2524_v54, %v2422_v58 }
 0x629   :  { %v2631_v1 = vpop.f32.mrb[48].mxu1 }
 0x62a   :  { %v2637_v3 = vadd.f32 %v2631_v1, %v2530_v63  ;;  %v3411_v4 = vpop.f32.mrb[49].mxu1 }
 0x62b   :  { %v2634_v5 = vpop.f32.mrb[50].mxu1 }
 0x62c   :  { %v2645_v6 = vadd.f32 %v3231_v2, %v2637_v3  ;;  %v3412_v7 = vpop.f32.mrb[51].mxu1 }
 0x62e   :  { %v2646_v8 = vmax.f32 %v2645_v6, 0.0 }
 0x630   :  { %v2647_v9 = vpack.c.bf16 %v2646_v8, %v2646_v8 }
 0x632   :  { %3430 = vmatmul.mubr.bf16.vlgmr.msra.gmra.mrb[48].mxu0 %v2647_v9 }
 0x705   :  { %v2753_v24 = vpop.f32.mrb[48].mxu0 }
 0x706   :  { %v2754_v28 = vadd.f32 %v3232_v22, %v2753_v24  ;;  %v3431_v29 = vpop.f32.mrb[49].mxu0 }
 0x707   :  { %v2756_v31 = vpop.f32.mrb[50].mxu0 }
 0x708   :  { %v2759_v12 = vmax.f32 %v2754_v28, 0.0  ;;  %v3432_v13 = vpop.f32.mrb[51].mxu0 }
 0x70a   :  { %v2760_v14 = vpack.c.bf16 %v2759_v12, %v2759_v12 }
 0x70c   :  { %3450 = vmatmul.mubr.bf16.vlgmr.msra.gmra.mrb[52].mxu1 %v2760_v14 }
 0x7df   :  { %v2866_v52 = vpop.f32.mrb[52].mxu1 }
 0x7e0   :  { %v2867_v17 = vadd.f32 %v3241_v37, %v2866_v52  ;;  %v3451_v41 = vpop.f32.mrb[53].mxu1 }
 0x7e1   :  { %v2869_v18 = vpop.f32.mrb[54].mxu1 }
 0x7e2   :  { %2872 = vst [vmem:[#allocation8] sm:$0x3] %v2867_v17  ;;  %v3452_v19 = vpop.f32.mrb[55].mxu1 }
 0x7e3   :  { %3907 = shalt.err (!%p3904_p0)
}
 0x7e4   :  { %s3908_s12 = scalar_lea.hbm %s4751_s13, 32 }
 0x7e5   :  { %p3909_p1 = scmp.ne.s32.totalorder %s4751_s13, %s3908_s12  ;;  %p3912_p2 = scmp.lt.u32.totalorder %s3908_s12, %s4751_s13 }
 0x7e7   :  { %p3914_p3 = pnand %p3912_p2, %p3909_p1 }
 0x7e9   :  { %3917 = shalt.err (!%p3914_p3)
}
 0x7ea   :  { %2882 = dma.vmem_to_hbm [thread:$0]  %s2880_s1, 32, %s4751_s13, [#allocation4]  }
 0x7eb   :  { %3922 = dma.done.wait [#allocation4], 32  }
 0x7ec   :  { %3923 = vsyncadd [#allocation4], 4294967264 }
 0x7ed   :  { %2886 = vsyncpa [#allocation3], 1 }
 0x7ee   :  { %2887 = vsyncpa [#allocation6], 1 }
 0x7ef   :  { %2888 = vsyncpa [#allocation4], 1 }

</bundles_post_ra>
